<compile_context>
chip_gen: v6e
topology: v6e:2x2x1
jax: 0.10.0
libtpu: 0.0.40
codegen_flags: <defaults>
</compile_context>

<pallas_src>
import functools

import jax
import jax.numpy as jnp
from jax.experimental import pallas as pl
from jax.experimental.pallas import tpu as pltpu

K = 5          # conv kernel size
PAD = K // 2   # "same" padding


def _conv_attention_kernel(x_ref, w_ref, b_ref, m_ref, o_ref, acc_ref, xf_ref,
                           *, L, lpad):
    # x_ref:   [1, Cin, N]      N = L*L, lane-dense
    # w_ref:   [K*K, Cout, Cin] per-tap contiguous weight tiles
    # b_ref:   [Cout, 1]
    # m_ref:   [K, N]           column-validity masks (one per kw), {0,1} f32
    # o_ref:   [1, Cout, N]
    # acc_ref: [Cout, N] f32    accumulator scratch
    # xf_ref:  [Cin, lpad + N + lpad] f32  flat zero-padded image scratch
    cin = x_ref.shape[1]
    n = x_ref.shape[2]
    cout = w_ref.shape[1]

    # Stage the image into the interior of the flat padded scratch.  The pads
    # are zero, so shifted reads that run past the first/last row read zeros.
    xf_ref[:, pl.ds(0, lpad)] = jnp.zeros((cin, lpad), jnp.float32)
    xf_ref[:, pl.ds(lpad + n, lpad)] = jnp.zeros((cin, lpad), jnp.float32)
    xf_ref[:, pl.ds(lpad, n)] = x_ref[0].astype(jnp.float32)

    # Bias folded into the accumulator init (single lane-broadcast per step).
    acc_ref[...] = jnp.broadcast_to(b_ref[...].astype(jnp.float32), (cout, n))

    # Hoist the 5 per-kw column masks out of the tap loop.
    col_masks = [m_ref[pl.ds(kw, 1), :] for kw in range(K)]

    # 5x5 conv = 25 shifted lane-offset reads of the flat image, each an
    # accumulating [Cout, Cin] @ [Cin, N] MXU dot into the VMEM accumulator.
    for kh in range(K):
        for kw in range(K):
            shift = (kh - PAD) * L + (kw - PAD)
            patch = xf_ref[:, pl.ds(lpad + shift, n)]          # [Cin, N]
            if kw != PAD:                                      # column boundary
                patch = patch * col_masks[kw]
            acc_ref[...] += jnp.dot(
                w_ref[kh * K + kw].astype(jnp.float32), patch,
                preferred_element_type=jnp.float32)

    o_ref[0] = acc_ref[...].astype(o_ref.dtype)


@jax.jit
def conv_attention_forward(x, weight, bias):
    """x: [B, C, L, L], weight: [C, C, 5, 5], bias: [C] -> [B, C, L, L]."""
    b, c, l, _ = x.shape
    n = l * l
    lpad = ((2 * l + 2 + 127) // 128) * 128   # 128-aligned flat halo (>= 2L+2)
    width = n + 2 * lpad

    x_flat = x.reshape(b, c, n)                                   # free reshape
    w_taps = jnp.transpose(weight, (2, 3, 0, 1)).reshape(K * K, c, c)
    bias_col = bias.reshape(c, 1)

    # Column-validity masks: masks[kw, r*L + col] = 1 iff 0 <= col + (kw-2) < L.
    col = jnp.arange(n, dtype=jnp.int32) % l
    masks = jnp.stack(
        [((col + (kw - PAD) >= 0) & (col + (kw - PAD) < l)).astype(jnp.float32)
         for kw in range(K)], axis=0)                             # [K, N]

    kernel = functools.partial(_conv_attention_kernel, L=l, lpad=lpad)

    flops = 2 * b * c * c * K * K * n
    bytes_accessed = (x.size + weight.size + bias.size + b * c * n) * x.dtype.itemsize

    vmem_need = 4 * (2 * 2 * c * n        # in/out blocks, double-buffered
                     + c * n              # f32 accumulator
                     + c * width          # padded flat image scratch
                     + K * K * 8 * 128    # weight taps (padded tiles)
                     + K * n)             # column masks
    vmem_limit = int(min(48 * 1024 * 1024, max(16 * 1024 * 1024, 2 * vmem_need)))

    out_flat = pl.pallas_call(
        kernel,
        out_shape=jax.ShapeDtypeStruct((b, c, n), x.dtype),
        grid_spec=pltpu.PrefetchScalarGridSpec(
            num_scalar_prefetch=0,
            grid=(b,),
            in_specs=[
                pl.BlockSpec((1, c, n), lambda i: (i, 0, 0)),       # x (lane-dense)
                pl.BlockSpec((K * K, c, c), lambda i: (0, 0, 0)),   # weight taps
                pl.BlockSpec((c, 1), lambda i: (0, 0)),             # bias
                pl.BlockSpec((K, n), lambda i: (0, 0)),             # column masks
            ],
            out_specs=pl.BlockSpec((1, c, n), lambda i: (i, 0, 0)),
            scratch_shapes=[
                pltpu.VMEM((c, n), jnp.float32),       # accumulator
                pltpu.VMEM((c, width), jnp.float32),   # flat zero-padded image
            ],
        ),
        compiler_params=pltpu.CompilerParams(
            dimension_semantics=("parallel",),
            vmem_limit_bytes=vmem_limit,
        ),
        cost_estimate=pl.CostEstimate(
            flops=flops, transcendentals=0, bytes_accessed=bytes_accessed),
    )(x_flat, w_taps, bias_col, masks)

    return out_flat.reshape(b, c, l, l)


def _reference_conv(x, weight, bias):
    out = jax.lax.conv_general_dilated(
        x, weight,
        window_strides=(1, 1),
        padding=((PAD, PAD), (PAD, PAD)),
        dimension_numbers=("NCHW", "OIHW", "NCHW"),
    )
    return out + bias.reshape(1, -1, 1, 1)


if __name__ == "__main__":
    B, C, L = 2, 4, 16  # x: [B, H, L, L] with H == channels

    key = jax.random.PRNGKey(0)
    kx, kwgt, kb = jax.random.split(key, 3)

    x = jax.random.normal(kx, (B, C, L, L), dtype=jnp.float32)
    # Deterministic synthetic Conv2d params (same shapes as nn.Conv2d(C, C, 5)).
    fan_in = C * K * K
    bound = 1.0 / (fan_in ** 0.5)
    weight = jax.random.uniform(kwgt, (C, C, K, K), jnp.float32, -bound, bound)
    bias = jax.random.uniform(kb, (C,), jnp.float32, -bound, bound)

    out = conv_attention_forward(x, weight, bias)
    out = jax.block_until_ready(out)

    ref = _reference_conv(x, weight, bias)
    assert out.shape == (B, C, L, L)
    assert jnp.allclose(out, ref, atol=1e-4, rtol=1e-4), "mismatch vs lax.conv reference"

    print("KERNEL_OK")
</pallas_src>

<mosaic_0001>
module attributes {stable_mosaic.version = 11 : i64} {
  func.func @_conv_attention_kernel(%arg0: i32, %arg1: memref<1x4x256xf32, #tpu.memory_space<vmem>>, %arg2: memref<25x4x4xf32, #tpu.memory_space<vmem>>, %arg3: memref<4x1xf32, #tpu.memory_space<vmem>>, %arg4: memref<5x256xf32, #tpu.memory_space<vmem>>, %arg5: memref<1x4x256xf32, #tpu.memory_space<vmem>>, %arg6: memref<4x256xf32, #tpu.memory_space<vmem>>, %arg7: memref<4x512xf32, #tpu.memory_space<vmem>>) attributes {dimension_semantics = [#tpu.dimension_semantics<parallel>], iteration_bounds = array<i64: 2>, scalar_prefetch = 0 : i64, scratch_operands = 2 : i64, tpu.core_type = #tpu.core_type<tc>, window_params = [{transform_indices = @transform_0, window_bounds = array<i64: 1, 4, 256>}, {pipeline_mode = #tpu.pipeline_mode<synchronous>, transform_indices = @transform_1, window_bounds = array<i64: 25, 4, 4>}, {pipeline_mode = #tpu.pipeline_mode<synchronous>, transform_indices = @transform_2, window_bounds = array<i64: 4, 1>}, {pipeline_mode = #tpu.pipeline_mode<synchronous>, transform_indices = @transform_3, window_bounds = array<i64: 5, 256>}, {transform_indices = @transform_4, window_bounds = array<i64: 1, 4, 256>}]} {
    %cst = arith.constant 0.000000e+00 : f32
    %0 = vector.broadcast %cst : f32 to vector<4x128xf32>
    %c0 = arith.constant 0 : index
    %c0_0 = arith.constant 0 : index
    %1 = vector.load %arg7[%c0, %c0_0] : memref<4x512xf32, #tpu.memory_space<vmem>>, vector<4x128xf32>
    tpu.vector_store %arg7[%c0, %c0_0], %0 {strides = array<i32>} : memref<4x512xf32, #tpu.memory_space<vmem>>, vector<4x128xf32>,
    %cst_1 = arith.constant 0.000000e+00 : f32
    %2 = vector.broadcast %cst_1 : f32 to vector<4x128xf32>
    %c0_2 = arith.constant 0 : index
    %c384 = arith.constant 384 : index
    %3 = vector.load %arg7[%c0_2, %c384] : memref<4x512xf32, #tpu.memory_space<vmem>>, vector<4x128xf32>
    tpu.vector_store %arg7[%c0_2, %c384], %2 {strides = array<i32>} : memref<4x512xf32, #tpu.memory_space<vmem>>, vector<4x128xf32>,
    %c0_3 = arith.constant 0 : index
    %c0_4 = arith.constant 0 : index
    %c0_5 = arith.constant 0 : index
    %4 = vector.load %arg1[%c0_3, %c0_4, %c0_5] : memref<1x4x256xf32, #tpu.memory_space<vmem>>, vector<1x4x256xf32>
    %5 = vector.shape_cast %4 : vector<1x4x256xf32> to vector<4x256xf32>
    %c0_6 = arith.constant 0 : index
    %c128 = arith.constant 128 : index
    %6 = vector.load %arg7[%c0_6, %c128] : memref<4x512xf32, #tpu.memory_space<vmem>>, vector<4x256xf32>
    tpu.vector_store %arg7[%c0_6, %c128], %5 {strides = array<i32>} : memref<4x512xf32, #tpu.memory_space<vmem>>, vector<4x256xf32>,
    %c0_7 = arith.constant 0 : index
    %c0_8 = arith.constant 0 : index
    %7 = vector.load %arg3[%c0_7, %c0_8] : memref<4x1xf32, #tpu.memory_space<vmem>>, vector<4x1xf32>
    %8 = vector.shape_cast %7 : vector<4x1xf32> to vector<4x1xf32>
    %9 = vector.broadcast %8 : vector<4x1xf32> to vector<4x256xf32>
    %c0_9 = arith.constant 0 : index
    %c0_10 = arith.constant 0 : index
    %10 = vector.load %arg6[%c0_9, %c0_10] : memref<4x256xf32, #tpu.memory_space<vmem>>, vector<4x256xf32>
    tpu.vector_store %arg6[%c0_9, %c0_10], %9 {strides = array<i32>} : memref<4x256xf32, #tpu.memory_space<vmem>>, vector<4x256xf32>,
    %c0_11 = arith.constant 0 : index
    %c0_12 = arith.constant 0 : index
    %11 = vector.load %arg4[%c0_11, %c0_12] : memref<5x256xf32, #tpu.memory_space<vmem>>, vector<1x256xf32>
    %c1 = arith.constant 1 : index
    %c0_13 = arith.constant 0 : index
    %12 = vector.load %arg4[%c1, %c0_13] : memref<5x256xf32, #tpu.memory_space<vmem>>, vector<1x256xf32>
    %c3 = arith.constant 3 : index
    %c0_14 = arith.constant 0 : index
    %13 = vector.load %arg4[%c3, %c0_14] : memref<5x256xf32, #tpu.memory_space<vmem>>, vector<1x256xf32>
    %c4 = arith.constant 4 : index
    %c0_15 = arith.constant 0 : index
    %14 = vector.load %arg4[%c4, %c0_15] : memref<5x256xf32, #tpu.memory_space<vmem>>, vector<1x256xf32>
    %c0_16 = arith.constant 0 : index
    %c94 = arith.constant 94 : index
    %15 = vector.load %arg7[%c0_16, %c94] : memref<4x512xf32, #tpu.memory_space<vmem>>, vector<4x256xf32>
    %16 = vector.broadcast %11 : vector<1x256xf32> to vector<4x256xf32>
    %17 = arith.mulf %15, %16 : vector<4x256xf32>
    %c0_17 = arith.constant 0 : index
    %c0_18 = arith.constant 0 : index
    %18 = vector.load %arg6[%c0_17, %c0_18] : memref<4x256xf32, #tpu.memory_space<vmem>>, vector<4x256xf32>
    %c0_19 = arith.constant 0 : index
    %c0_20 = arith.constant 0 : index
    %c0_21 = arith.constant 0 : index
    %19 = vector.load %arg2[%c0_19, %c0_20, %c0_21] : memref<25x4x4xf32, #tpu.memory_space<vmem>>, vector<1x4x4xf32>
    %20 = vector.shape_cast %19 : vector<1x4x4xf32> to vector<4x4xf32>
    %cst_22 = arith.constant dense<0.000000e+00> : vector<4x256xf32>
    %21 = tpu.matmul %20, %17, %cst_22 {dimension_numbers = #tpu.dot_dimension_numbers<[1], [0], [0], [1], [0, 0, 1, 1], [], []>} : vector<4x4xf32>, vector<4x256xf32>, vector<4x256xf32> -> vector<4x256xf32>
    %22 = arith.addf %18, %21 : vector<4x256xf32>
    %c0_23 = arith.constant 0 : index
    %c0_24 = arith.constant 0 : index
    %23 = vector.load %arg6[%c0_23, %c0_24] : memref<4x256xf32, #tpu.memory_space<vmem>>, vector<4x256xf32>
    tpu.vector_store %arg6[%c0_23, %c0_24], %22 {strides = array<i32>} : memref<4x256xf32, #tpu.memory_space<vmem>>, vector<4x256xf32>,
    %c0_25 = arith.constant 0 : index
    %c95 = arith.constant 95 : index
    %24 = vector.load %arg7[%c0_25, %c95] : memref<4x512xf32, #tpu.memory_space<vmem>>, vector<4x256xf32>
    %25 = vector.broadcast %12 : vector<1x256xf32> to vector<4x256xf32>
    %26 = arith.mulf %24, %25 : vector<4x256xf32>
    %c0_26 = arith.constant 0 : index
    %c0_27 = arith.constant 0 : index
    %27 = vector.load %arg6[%c0_26, %c0_27] : memref<4x256xf32, #tpu.memory_space<vmem>>, vector<4x256xf32>
    %c1_28 = arith.constant 1 : index
    %c0_29 = arith.constant 0 : index
    %c0_30 = arith.constant 0 : index
    %28 = vector.load %arg2[%c1_28, %c0_29, %c0_30] : memref<25x4x4xf32, #tpu.memory_space<vmem>>, vector<1x4x4xf32>
    %29 = vector.shape_cast %28 : vector<1x4x4xf32> to vector<4x4xf32>
    %cst_31 = arith.constant dense<0.000000e+00> : vector<4x256xf32>
    %30 = tpu.matmul %29, %26, %cst_31 {dimension_numbers = #tpu.dot_dimension_numbers<[1], [0], [0], [1], [0, 0, 1, 1], [], []>} : vector<4x4xf32>, vector<4x256xf32>, vector<4x256xf32> -> vector<4x256xf32>
    %31 = arith.addf %27, %30 : vector<4x256xf32>
    %c0_32 = arith.constant 0 : index
    %c0_33 = arith.constant 0 : index
    %32 = vector.load %arg6[%c0_32, %c0_33] : memref<4x256xf32, #tpu.memory_space<vmem>>, vector<4x256xf32>
    tpu.vector_store %arg6[%c0_32, %c0_33], %31 {strides = array<i32>} : memref<4x256xf32, #tpu.memory_space<vmem>>, vector<4x256xf32>,
    %c0_34 = arith.constant 0 : index
    %c96 = arith.constant 96 : index
    %33 = vector.load %arg7[%c0_34, %c96] : memref<4x512xf32, #tpu.memory_space<vmem>>, vector<4x256xf32>
    %c0_35 = arith.constant 0 : index
    %c0_36 = arith.constant 0 : index
    %34 = vector.load %arg6[%c0_35, %c0_36] : memref<4x256xf32, #tpu.memory_space<vmem>>, vector<4x256xf32>
    %c2 = arith.constant 2 : index
    %c0_37 = arith.constant 0 : index
    %c0_38 = arith.constant 0 : index
    %35 = vector.load %arg2[%c2, %c0_37, %c0_38] : memref<25x4x4xf32, #tpu.memory_space<vmem>>, vector<1x4x4xf32>
    %36 = vector.shape_cast %35 : vector<1x4x4xf32> to vector<4x4xf32>
    %cst_39 = arith.constant dense<0.000000e+00> : vector<4x256xf32>
    %37 = tpu.matmul %36, %33, %cst_39 {dimension_numbers = #tpu.dot_dimension_numbers<[1], [0], [0], [1], [0, 0, 1, 1], [], []>} : vector<4x4xf32>, vector<4x256xf32>, vector<4x256xf32> -> vector<4x256xf32>
    %38 = arith.addf %34, %37 : vector<4x256xf32>
    %c0_40 = arith.constant 0 : index
    %c0_41 = arith.constant 0 : index
    %39 = vector.load %arg6[%c0_40, %c0_41] : memref<4x256xf32, #tpu.memory_space<vmem>>, vector<4x256xf32>
    tpu.vector_store %arg6[%c0_40, %c0_41], %38 {strides = array<i32>} : memref<4x256xf32, #tpu.memory_space<vmem>>, vector<4x256xf32>,
    %c0_42 = arith.constant 0 : index
    %c97 = arith.constant 97 : index
    %40 = vector.load %arg7[%c0_42, %c97] : memref<4x512xf32, #tpu.memory_space<vmem>>, vector<4x256xf32>
    %41 = vector.broadcast %13 : vector<1x256xf32> to vector<4x256xf32>
    %42 = arith.mulf %40, %41 : vector<4x256xf32>
    %c0_43 = arith.constant 0 : index
    %c0_44 = arith.constant 0 : index
    %43 = vector.load %arg6[%c0_43, %c0_44] : memref<4x256xf32, #tpu.memory_space<vmem>>, vector<4x256xf32>
    %c3_45 = arith.constant 3 : index
    %c0_46 = arith.constant 0 : index
    %c0_47 = arith.constant 0 : index
    %44 = vector.load %arg2[%c3_45, %c0_46, %c0_47] : memref<25x4x4xf32, #tpu.memory_space<vmem>>, vector<1x4x4xf32>
    %45 = vector.shape_cast %44 : vector<1x4x4xf32> to vector<4x4xf32>
    %cst_48 = arith.constant dense<0.000000e+00> : vector<4x256xf32>
    %46 = tpu.matmul %45, %42, %cst_48 {dimension_numbers = #tpu.dot_dimension_numbers<[1], [0], [0], [1], [0, 0, 1, 1], [], []>} : vector<4x4xf32>, vector<4x256xf32>, vector<4x256xf32> -> vector<4x256xf32>
    %47 = arith.addf %43, %46 : vector<4x256xf32>
    %c0_49 = arith.constant 0 : index
    %c0_50 = arith.constant 0 : index
    %48 = vector.load %arg6[%c0_49, %c0_50] : memref<4x256xf32, #tpu.memory_space<vmem>>, vector<4x256xf32>
    tpu.vector_store %arg6[%c0_49, %c0_50], %47 {strides = array<i32>} : memref<4x256xf32, #tpu.memory_space<vmem>>, vector<4x256xf32>,
    %c0_51 = arith.constant 0 : index
    %c98 = arith.constant 98 : index
    %49 = vector.load %arg7[%c0_51, %c98] : memref<4x512xf32, #tpu.memory_space<vmem>>, vector<4x256xf32>
    %50 = vector.broadcast %14 : vector<1x256xf32> to vector<4x256xf32>
    %51 = arith.mulf %49, %50 : vector<4x256xf32>
    %c0_52 = arith.constant 0 : index
    %c0_53 = arith.constant 0 : index
    %52 = vector.load %arg6[%c0_52, %c0_53] : memref<4x256xf32, #tpu.memory_space<vmem>>, vector<4x256xf32>
    %c4_54 = arith.constant 4 : index
    %c0_55 = arith.constant 0 : index
    %c0_56 = arith.constant 0 : index
    %53 = vector.load %arg2[%c4_54, %c0_55, %c0_56] : memref<25x4x4xf32, #tpu.memory_space<vmem>>, vector<1x4x4xf32>
    %54 = vector.shape_cast %53 : vector<1x4x4xf32> to vector<4x4xf32>
    %cst_57 = arith.constant dense<0.000000e+00> : vector<4x256xf32>
    %55 = tpu.matmul %54, %51, %cst_57 {dimension_numbers = #tpu.dot_dimension_numbers<[1], [0], [0], [1], [0, 0, 1, 1], [], []>} : vector<4x4xf32>, vector<4x256xf32>, vector<4x256xf32> -> vector<4x256xf32>
    %56 = arith.addf %52, %55 : vector<4x256xf32>
    %c0_58 = arith.constant 0 : index
    %c0_59 = arith.constant 0 : index
    %57 = vector.load %arg6[%c0_58, %c0_59] : memref<4x256xf32, #tpu.memory_space<vmem>>, vector<4x256xf32>
    tpu.vector_store %arg6[%c0_58, %c0_59], %56 {strides = array<i32>} : memref<4x256xf32, #tpu.memory_space<vmem>>, vector<4x256xf32>,
    %c0_60 = arith.constant 0 : index
    %c110 = arith.constant 110 : index
    %58 = vector.load %arg7[%c0_60, %c110] : memref<4x512xf32, #tpu.memory_space<vmem>>, vector<4x256xf32>
    %59 = vector.broadcast %11 : vector<1x256xf32> to vector<4x256xf32>
    %60 = arith.mulf %58, %59 : vector<4x256xf32>
    %c0_61 = arith.constant 0 : index
    %c0_62 = arith.constant 0 : index
    %61 = vector.load %arg6[%c0_61, %c0_62] : memref<4x256xf32, #tpu.memory_space<vmem>>, vector<4x256xf32>
    %c5 = arith.constant 5 : index
    %c0_63 = arith.constant 0 : index
    %c0_64 = arith.constant 0 : index
    %62 = vector.load %arg2[%c5, %c0_63, %c0_64] : memref<25x4x4xf32, #tpu.memory_space<vmem>>, vector<1x4x4xf32>
    %63 = vector.shape_cast %62 : vector<1x4x4xf32> to vector<4x4xf32>
    %cst_65 = arith.constant dense<0.000000e+00> : vector<4x256xf32>
    %64 = tpu.matmul %63, %60, %cst_65 {dimension_numbers = #tpu.dot_dimension_numbers<[1], [0], [0], [1], [0, 0, 1, 1], [], []>} : vector<4x4xf32>, vector<4x256xf32>, vector<4x256xf32> -> vector<4x256xf32>
    %65 = arith.addf %61, %64 : vector<4x256xf32>
    %c0_66 = arith.constant 0 : index
    %c0_67 = arith.constant 0 : index
    %66 = vector.load %arg6[%c0_66, %c0_67] : memref<4x256xf32, #tpu.memory_space<vmem>>, vector<4x256xf32>
    tpu.vector_store %arg6[%c0_66, %c0_67], %65 {strides = array<i32>} : memref<4x256xf32, #tpu.memory_space<vmem>>, vector<4x256xf32>,
    %c0_68 = arith.constant 0 : index
    %c111 = arith.constant 111 : index
    %67 = vector.load %arg7[%c0_68, %c111] : memref<4x512xf32, #tpu.memory_space<vmem>>, vector<4x256xf32>
    %68 = vector.broadcast %12 : vector<1x256xf32> to vector<4x256xf32>
    %69 = arith.mulf %67, %68 : vector<4x256xf32>
    %c0_69 = arith.constant 0 : index
    %c0_70 = arith.constant 0 : index
    %70 = vector.load %arg6[%c0_69, %c0_70] : memref<4x256xf32, #tpu.memory_space<vmem>>, vector<4x256xf32>
    %c6 = arith.constant 6 : index
    %c0_71 = arith.constant 0 : index
    %c0_72 = arith.constant 0 : index
    %71 = vector.load %arg2[%c6, %c0_71, %c0_72] : memref<25x4x4xf32, #tpu.memory_space<vmem>>, vector<1x4x4xf32>
    %72 = vector.shape_cast %71 : vector<1x4x4xf32> to vector<4x4xf32>
    %cst_73 = arith.constant dense<0.000000e+00> : vector<4x256xf32>
    %73 = tpu.matmul %72, %69, %cst_73 {dimension_numbers = #tpu.dot_dimension_numbers<[1], [0], [0], [1], [0, 0, 1, 1], [], []>} : vector<4x4xf32>, vector<4x256xf32>, vector<4x256xf32> -> vector<4x256xf32>
    %74 = arith.addf %70, %73 : vector<4x256xf32>
    %c0_74 = arith.constant 0 : index
    %c0_75 = arith.constant 0 : index
    %75 = vector.load %arg6[%c0_74, %c0_75] : memref<4x256xf32, #tpu.memory_space<vmem>>, vector<4x256xf32>
    tpu.vector_store %arg6[%c0_74, %c0_75], %74 {strides = array<i32>} : memref<4x256xf32, #tpu.memory_space<vmem>>, vector<4x256xf32>,
    %c0_76 = arith.constant 0 : index
    %c112 = arith.constant 112 : index
    %76 = vector.load %arg7[%c0_76, %c112] : memref<4x512xf32, #tpu.memory_space<vmem>>, vector<4x256xf32>
    %c0_77 = arith.constant 0 : index
    %c0_78 = arith.constant 0 : index
    %77 = vector.load %arg6[%c0_77, %c0_78] : memref<4x256xf32, #tpu.memory_space<vmem>>, vector<4x256xf32>
    %c7 = arith.constant 7 : index
    %c0_79 = arith.constant 0 : index
    %c0_80 = arith.constant 0 : index
    %78 = vector.load %arg2[%c7, %c0_79, %c0_80] : memref<25x4x4xf32, #tpu.memory_space<vmem>>, vector<1x4x4xf32>
    %79 = vector.shape_cast %78 : vector<1x4x4xf32> to vector<4x4xf32>
    %cst_81 = arith.constant dense<0.000000e+00> : vector<4x256xf32>
    %80 = tpu.matmul %79, %76, %cst_81 {dimension_numbers = #tpu.dot_dimension_numbers<[1], [0], [0], [1], [0, 0, 1, 1], [], []>} : vector<4x4xf32>, vector<4x256xf32>, vector<4x256xf32> -> vector<4x256xf32>
    %81 = arith.addf %77, %80 : vector<4x256xf32>
    %c0_82 = arith.constant 0 : index
    %c0_83 = arith.constant 0 : index
    %82 = vector.load %arg6[%c0_82, %c0_83] : memref<4x256xf32, #tpu.memory_space<vmem>>, vector<4x256xf32>
    tpu.vector_store %arg6[%c0_82, %c0_83], %81 {strides = array<i32>} : memref<4x256xf32, #tpu.memory_space<vmem>>, vector<4x256xf32>,
    %c0_84 = arith.constant 0 : index
    %c113 = arith.constant 113 : index
    %83 = vector.load %arg7[%c0_84, %c113] : memref<4x512xf32, #tpu.memory_space<vmem>>, vector<4x256xf32>
    %84 = vector.broadcast %13 : vector<1x256xf32> to vector<4x256xf32>
    %85 = arith.mulf %83, %84 : vector<4x256xf32>
    %c0_85 = arith.constant 0 : index
    %c0_86 = arith.constant 0 : index
    %86 = vector.load %arg6[%c0_85, %c0_86] : memref<4x256xf32, #tpu.memory_space<vmem>>, vector<4x256xf32>
    %c8 = arith.constant 8 : index
    %c0_87 = arith.constant 0 : index
    %c0_88 = arith.constant 0 : index
    %87 = vector.load %arg2[%c8, %c0_87, %c0_88] : memref<25x4x4xf32, #tpu.memory_space<vmem>>, vector<1x4x4xf32>
    %88 = vector.shape_cast %87 : vector<1x4x4xf32> to vector<4x4xf32>
    %cst_89 = arith.constant dense<0.000000e+00> : vector<4x256xf32>
    %89 = tpu.matmul %88, %85, %cst_89 {dimension_numbers = #tpu.dot_dimension_numbers<[1], [0], [0], [1], [0, 0, 1, 1], [], []>} : vector<4x4xf32>, vector<4x256xf32>, vector<4x256xf32> -> vector<4x256xf32>
    %90 = arith.addf %86, %89 : vector<4x256xf32>
    %c0_90 = arith.constant 0 : index
    %c0_91 = arith.constant 0 : index
    %91 = vector.load %arg6[%c0_90, %c0_91] : memref<4x256xf32, #tpu.memory_space<vmem>>, vector<4x256xf32>
    tpu.vector_store %arg6[%c0_90, %c0_91], %90 {strides = array<i32>} : memref<4x256xf32, #tpu.memory_space<vmem>>, vector<4x256xf32>,
    %c0_92 = arith.constant 0 : index
    %c114 = arith.constant 114 : index
    %92 = vector.load %arg7[%c0_92, %c114] : memref<4x512xf32, #tpu.memory_space<vmem>>, vector<4x256xf32>
    %93 = vector.broadcast %14 : vector<1x256xf32> to vector<4x256xf32>
    %94 = arith.mulf %92, %93 : vector<4x256xf32>
    %c0_93 = arith.constant 0 : index
    %c0_94 = arith.constant 0 : index
    %95 = vector.load %arg6[%c0_93, %c0_94] : memref<4x256xf32, #tpu.memory_space<vmem>>, vector<4x256xf32>
    %c9 = arith.constant 9 : index
    %c0_95 = arith.constant 0 : index
    %c0_96 = arith.constant 0 : index
    %96 = vector.load %arg2[%c9, %c0_95, %c0_96] : memref<25x4x4xf32, #tpu.memory_space<vmem>>, vector<1x4x4xf32>
    %97 = vector.shape_cast %96 : vector<1x4x4xf32> to vector<4x4xf32>
    %cst_97 = arith.constant dense<0.000000e+00> : vector<4x256xf32>
    %98 = tpu.matmul %97, %94, %cst_97 {dimension_numbers = #tpu.dot_dimension_numbers<[1], [0], [0], [1], [0, 0, 1, 1], [], []>} : vector<4x4xf32>, vector<4x256xf32>, vector<4x256xf32> -> vector<4x256xf32>
    %99 = arith.addf %95, %98 : vector<4x256xf32>
    %c0_98 = arith.constant 0 : index
    %c0_99 = arith.constant 0 : index
    %100 = vector.load %arg6[%c0_98, %c0_99] : memref<4x256xf32, #tpu.memory_space<vmem>>, vector<4x256xf32>
    tpu.vector_store %arg6[%c0_98, %c0_99], %99 {strides = array<i32>} : memref<4x256xf32, #tpu.memory_space<vmem>>, vector<4x256xf32>,
    %c0_100 = arith.constant 0 : index
    %c126 = arith.constant 126 : index
    %101 = vector.load %arg7[%c0_100, %c126] : memref<4x512xf32, #tpu.memory_space<vmem>>, vector<4x256xf32>
    %102 = vector.broadcast %11 : vector<1x256xf32> to vector<4x256xf32>
    %103 = arith.mulf %101, %102 : vector<4x256xf32>
    %c0_101 = arith.constant 0 : index
    %c0_102 = arith.constant 0 : index
    %104 = vector.load %arg6[%c0_101, %c0_102] : memref<4x256xf32, #tpu.memory_space<vmem>>, vector<4x256xf32>
    %c10 = arith.constant 10 : index
    %c0_103 = arith.constant 0 : index
    %c0_104 = arith.constant 0 : index
    %105 = vector.load %arg2[%c10, %c0_103, %c0_104] : memref<25x4x4xf32, #tpu.memory_space<vmem>>, vector<1x4x4xf32>
    %106 = vector.shape_cast %105 : vector<1x4x4xf32> to vector<4x4xf32>
    %cst_105 = arith.constant dense<0.000000e+00> : vector<4x256xf32>
    %107 = tpu.matmul %106, %103, %cst_105 {dimension_numbers = #tpu.dot_dimension_numbers<[1], [0], [0], [1], [0, 0, 1, 1], [], []>} : vector<4x4xf32>, vector<4x256xf32>, vector<4x256xf32> -> vector<4x256xf32>
    %108 = arith.addf %104, %107 : vector<4x256xf32>
    %c0_106 = arith.constant 0 : index
    %c0_107 = arith.constant 0 : index
    %109 = vector.load %arg6[%c0_106, %c0_107] : memref<4x256xf32, #tpu.memory_space<vmem>>, vector<4x256xf32>
    tpu.vector_store %arg6[%c0_106, %c0_107], %108 {strides = array<i32>} : memref<4x256xf32, #tpu.memory_space<vmem>>, vector<4x256xf32>,
    %c0_108 = arith.constant 0 : index
    %c127 = arith.constant 127 : index
    %110 = vector.load %arg7[%c0_108, %c127] : memref<4x512xf32, #tpu.memory_space<vmem>>, vector<4x256xf32>
    %111 = vector.broadcast %12 : vector<1x256xf32> to vector<4x256xf32>
    %112 = arith.mulf %110, %111 : vector<4x256xf32>
    %c0_109 = arith.constant 0 : index
    %c0_110 = arith.constant 0 : index
    %113 = vector.load %arg6[%c0_109, %c0_110] : memref<4x256xf32, #tpu.memory_space<vmem>>, vector<4x256xf32>
    %c11 = arith.constant 11 : index
    %c0_111 = arith.constant 0 : index
    %c0_112 = arith.constant 0 : index
    %114 = vector.load %arg2[%c11, %c0_111, %c0_112] : memref<25x4x4xf32, #tpu.memory_space<vmem>>, vector<1x4x4xf32>
    %115 = vector.shape_cast %114 : vector<1x4x4xf32> to vector<4x4xf32>
    %cst_113 = arith.constant dense<0.000000e+00> : vector<4x256xf32>
    %116 = tpu.matmul %115, %112, %cst_113 {dimension_numbers = #tpu.dot_dimension_numbers<[1], [0], [0], [1], [0, 0, 1, 1], [], []>} : vector<4x4xf32>, vector<4x256xf32>, vector<4x256xf32> -> vector<4x256xf32>
    %117 = arith.addf %113, %116 : vector<4x256xf32>
    %c0_114 = arith.constant 0 : index
    %c0_115 = arith.constant 0 : index
    %118 = vector.load %arg6[%c0_114, %c0_115] : memref<4x256xf32, #tpu.memory_space<vmem>>, vector<4x256xf32>
    tpu.vector_store %arg6[%c0_114, %c0_115], %117 {strides = array<i32>} : memref<4x256xf32, #tpu.memory_space<vmem>>, vector<4x256xf32>,
    %c0_116 = arith.constant 0 : index
    %c128_117 = arith.constant 128 : index
    %119 = vector.load %arg7[%c0_116, %c128_117] : memref<4x512xf32, #tpu.memory_space<vmem>>, vector<4x256xf32>
    %c0_118 = arith.constant 0 : index
    %c0_119 = arith.constant 0 : index
    %120 = vector.load %arg6[%c0_118, %c0_119] : memref<4x256xf32, #tpu.memory_space<vmem>>, vector<4x256xf32>
    %c12 = arith.constant 12 : index
    %c0_120 = arith.constant 0 : index
    %c0_121 = arith.constant 0 : index
    %121 = vector.load %arg2[%c12, %c0_120, %c0_121] : memref<25x4x4xf32, #tpu.memory_space<vmem>>, vector<1x4x4xf32>
    %122 = vector.shape_cast %121 : vector<1x4x4xf32> to vector<4x4xf32>
    %cst_122 = arith.constant dense<0.000000e+00> : vector<4x256xf32>
    %123 = tpu.matmul %122, %119, %cst_122 {dimension_numbers = #tpu.dot_dimension_numbers<[1], [0], [0], [1], [0, 0, 1, 1], [], []>} : vector<4x4xf32>, vector<4x256xf32>, vector<4x256xf32> -> vector<4x256xf32>
    %124 = arith.addf %120, %123 : vector<4x256xf32>
    %c0_123 = arith.constant 0 : index
    %c0_124 = arith.constant 0 : index
    %125 = vector.load %arg6[%c0_123, %c0_124] : memref<4x256xf32, #tpu.memory_space<vmem>>, vector<4x256xf32>
    tpu.vector_store %arg6[%c0_123, %c0_124], %124 {strides = array<i32>} : memref<4x256xf32, #tpu.memory_space<vmem>>, vector<4x256xf32>,
    %c0_125 = arith.constant 0 : index
    %c129 = arith.constant 129 : index
    %126 = vector.load %arg7[%c0_125, %c129] : memref<4x512xf32, #tpu.memory_space<vmem>>, vector<4x256xf32>
    %127 = vector.broadcast %13 : vector<1x256xf32> to vector<4x256xf32>
    %128 = arith.mulf %126, %127 : vector<4x256xf32>
    %c0_126 = arith.constant 0 : index
    %c0_127 = arith.constant 0 : index
    %129 = vector.load %arg6[%c0_126, %c0_127] : memref<4x256xf32, #tpu.memory_space<vmem>>, vector<4x256xf32>
    %c13 = arith.constant 13 : index
    %c0_128 = arith.constant 0 : index
    %c0_129 = arith.constant 0 : index
    %130 = vector.load %arg2[%c13, %c0_128, %c0_129] : memref<25x4x4xf32, #tpu.memory_space<vmem>>, vector<1x4x4xf32>
    %131 = vector.shape_cast %130 : vector<1x4x4xf32> to vector<4x4xf32>
    %cst_130 = arith.constant dense<0.000000e+00> : vector<4x256xf32>
    %132 = tpu.matmul %131, %128, %cst_130 {dimension_numbers = #tpu.dot_dimension_numbers<[1], [0], [0], [1], [0, 0, 1, 1], [], []>} : vector<4x4xf32>, vector<4x256xf32>, vector<4x256xf32> -> vector<4x256xf32>
    %133 = arith.addf %129, %132 : vector<4x256xf32>
    %c0_131 = arith.constant 0 : index
    %c0_132 = arith.constant 0 : index
    %134 = vector.load %arg6[%c0_131, %c0_132] : memref<4x256xf32, #tpu.memory_space<vmem>>, vector<4x256xf32>
    tpu.vector_store %arg6[%c0_131, %c0_132], %133 {strides = array<i32>} : memref<4x256xf32, #tpu.memory_space<vmem>>, vector<4x256xf32>,
    %c0_133 = arith.constant 0 : index
    %c130 = arith.constant 130 : index
    %135 = vector.load %arg7[%c0_133, %c130] : memref<4x512xf32, #tpu.memory_space<vmem>>, vector<4x256xf32>
    %136 = vector.broadcast %14 : vector<1x256xf32> to vector<4x256xf32>
    %137 = arith.mulf %135, %136 : vector<4x256xf32>
    %c0_134 = arith.constant 0 : index
    %c0_135 = arith.constant 0 : index
    %138 = vector.load %arg6[%c0_134, %c0_135] : memref<4x256xf32, #tpu.memory_space<vmem>>, vector<4x256xf32>
    %c14 = arith.constant 14 : index
    %c0_136 = arith.constant 0 : index
    %c0_137 = arith.constant 0 : index
    %139 = vector.load %arg2[%c14, %c0_136, %c0_137] : memref<25x4x4xf32, #tpu.memory_space<vmem>>, vector<1x4x4xf32>
    %140 = vector.shape_cast %139 : vector<1x4x4xf32> to vector<4x4xf32>
    %cst_138 = arith.constant dense<0.000000e+00> : vector<4x256xf32>
    %141 = tpu.matmul %140, %137, %cst_138 {dimension_numbers = #tpu.dot_dimension_numbers<[1], [0], [0], [1], [0, 0, 1, 1], [], []>} : vector<4x4xf32>, vector<4x256xf32>, vector<4x256xf32> -> vector<4x256xf32>
    %142 = arith.addf %138, %141 : vector<4x256xf32>
    %c0_139 = arith.constant 0 : index
    %c0_140 = arith.constant 0 : index
    %143 = vector.load %arg6[%c0_139, %c0_140] : memref<4x256xf32, #tpu.memory_space<vmem>>, vector<4x256xf32>
    tpu.vector_store %arg6[%c0_139, %c0_140], %142 {strides = array<i32>} : memref<4x256xf32, #tpu.memory_space<vmem>>, vector<4x256xf32>,
    %c0_141 = arith.constant 0 : index
    %c142 = arith.constant 142 : index
    %144 = vector.load %arg7[%c0_141, %c142] : memref<4x512xf32, #tpu.memory_space<vmem>>, vector<4x256xf32>
    %145 = vector.broadcast %11 : vector<1x256xf32> to vector<4x256xf32>
    %146 = arith.mulf %144, %145 : vector<4x256xf32>
    %c0_142 = arith.constant 0 : index
    %c0_143 = arith.constant 0 : index
    %147 = vector.load %arg6[%c0_142, %c0_143] : memref<4x256xf32, #tpu.memory_space<vmem>>, vector<4x256xf32>
    %c15 = arith.constant 15 : index
    %c0_144 = arith.constant 0 : index
    %c0_145 = arith.constant 0 : index
    %148 = vector.load %arg2[%c15, %c0_144, %c0_145] : memref<25x4x4xf32, #tpu.memory_space<vmem>>, vector<1x4x4xf32>
    %149 = vector.shape_cast %148 : vector<1x4x4xf32> to vector<4x4xf32>
    %cst_146 = arith.constant dense<0.000000e+00> : vector<4x256xf32>
    %150 = tpu.matmul %149, %146, %cst_146 {dimension_numbers = #tpu.dot_dimension_numbers<[1], [0], [0], [1], [0, 0, 1, 1], [], []>} : vector<4x4xf32>, vector<4x256xf32>, vector<4x256xf32> -> vector<4x256xf32>
    %151 = arith.addf %147, %150 : vector<4x256xf32>
    %c0_147 = arith.constant 0 : index
    %c0_148 = arith.constant 0 : index
    %152 = vector.load %arg6[%c0_147, %c0_148] : memref<4x256xf32, #tpu.memory_space<vmem>>, vector<4x256xf32>
    tpu.vector_store %arg6[%c0_147, %c0_148], %151 {strides = array<i32>} : memref<4x256xf32, #tpu.memory_space<vmem>>, vector<4x256xf32>,
    %c0_149 = arith.constant 0 : index
    %c143 = arith.constant 143 : index
    %153 = vector.load %arg7[%c0_149, %c143] : memref<4x512xf32, #tpu.memory_space<vmem>>, vector<4x256xf32>
    %154 = vector.broadcast %12 : vector<1x256xf32> to vector<4x256xf32>
    %155 = arith.mulf %153, %154 : vector<4x256xf32>
    %c0_150 = arith.constant 0 : index
    %c0_151 = arith.constant 0 : index
    %156 = vector.load %arg6[%c0_150, %c0_151] : memref<4x256xf32, #tpu.memory_space<vmem>>, vector<4x256xf32>
    %c16 = arith.constant 16 : index
    %c0_152 = arith.constant 0 : index
    %c0_153 = arith.constant 0 : index
    %157 = vector.load %arg2[%c16, %c0_152, %c0_153] : memref<25x4x4xf32, #tpu.memory_space<vmem>>, vector<1x4x4xf32>
    %158 = vector.shape_cast %157 : vector<1x4x4xf32> to vector<4x4xf32>
    %cst_154 = arith.constant dense<0.000000e+00> : vector<4x256xf32>
    %159 = tpu.matmul %158, %155, %cst_154 {dimension_numbers = #tpu.dot_dimension_numbers<[1], [0], [0], [1], [0, 0, 1, 1], [], []>} : vector<4x4xf32>, vector<4x256xf32>, vector<4x256xf32> -> vector<4x256xf32>
    %160 = arith.addf %156, %159 : vector<4x256xf32>
    %c0_155 = arith.constant 0 : index
    %c0_156 = arith.constant 0 : index
    %161 = vector.load %arg6[%c0_155, %c0_156] : memref<4x256xf32, #tpu.memory_space<vmem>>, vector<4x256xf32>
    tpu.vector_store %arg6[%c0_155, %c0_156], %160 {strides = array<i32>} : memref<4x256xf32, #tpu.memory_space<vmem>>, vector<4x256xf32>,
    %c0_157 = arith.constant 0 : index
    %c144 = arith.constant 144 : index
    %162 = vector.load %arg7[%c0_157, %c144] : memref<4x512xf32, #tpu.memory_space<vmem>>, vector<4x256xf32>
    %c0_158 = arith.constant 0 : index
    %c0_159 = arith.constant 0 : index
    %163 = vector.load %arg6[%c0_158, %c0_159] : memref<4x256xf32, #tpu.memory_space<vmem>>, vector<4x256xf32>
    %c17 = arith.constant 17 : index
    %c0_160 = arith.constant 0 : index
    %c0_161 = arith.constant 0 : index
    %164 = vector.load %arg2[%c17, %c0_160, %c0_161] : memref<25x4x4xf32, #tpu.memory_space<vmem>>, vector<1x4x4xf32>
    %165 = vector.shape_cast %164 : vector<1x4x4xf32> to vector<4x4xf32>
    %cst_162 = arith.constant dense<0.000000e+00> : vector<4x256xf32>
    %166 = tpu.matmul %165, %162, %cst_162 {dimension_numbers = #tpu.dot_dimension_numbers<[1], [0], [0], [1], [0, 0, 1, 1], [], []>} : vector<4x4xf32>, vector<4x256xf32>, vector<4x256xf32> -> vector<4x256xf32>
    %167 = arith.addf %163, %166 : vector<4x256xf32>
    %c0_163 = arith.constant 0 : index
    %c0_164 = arith.constant 0 : index
    %168 = vector.load %arg6[%c0_163, %c0_164] : memref<4x256xf32, #tpu.memory_space<vmem>>, vector<4x256xf32>
    tpu.vector_store %arg6[%c0_163, %c0_164], %167 {strides = array<i32>} : memref<4x256xf32, #tpu.memory_space<vmem>>, vector<4x256xf32>,
    %c0_165 = arith.constant 0 : index
    %c145 = arith.constant 145 : index
    %169 = vector.load %arg7[%c0_165, %c145] : memref<4x512xf32, #tpu.memory_space<vmem>>, vector<4x256xf32>
    %170 = vector.broadcast %13 : vector<1x256xf32> to vector<4x256xf32>
    %171 = arith.mulf %169, %170 : vector<4x256xf32>
    %c0_166 = arith.constant 0 : index
    %c0_167 = arith.constant 0 : index
    %172 = vector.load %arg6[%c0_166, %c0_167] : memref<4x256xf32, #tpu.memory_space<vmem>>, vector<4x256xf32>
    %c18 = arith.constant 18 : index
    %c0_168 = arith.constant 0 : index
    %c0_169 = arith.constant 0 : index
    %173 = vector.load %arg2[%c18, %c0_168, %c0_169] : memref<25x4x4xf32, #tpu.memory_space<vmem>>, vector<1x4x4xf32>
    %174 = vector.shape_cast %173 : vector<1x4x4xf32> to vector<4x4xf32>
    %cst_170 = arith.constant dense<0.000000e+00> : vector<4x256xf32>
    %175 = tpu.matmul %174, %171, %cst_170 {dimension_numbers = #tpu.dot_dimension_numbers<[1], [0], [0], [1], [0, 0, 1, 1], [], []>} : vector<4x4xf32>, vector<4x256xf32>, vector<4x256xf32> -> vector<4x256xf32>
    %176 = arith.addf %172, %175 : vector<4x256xf32>
    %c0_171 = arith.constant 0 : index
    %c0_172 = arith.constant 0 : index
    %177 = vector.load %arg6[%c0_171, %c0_172] : memref<4x256xf32, #tpu.memory_space<vmem>>, vector<4x256xf32>
    tpu.vector_store %arg6[%c0_171, %c0_172], %176 {strides = array<i32>} : memref<4x256xf32, #tpu.memory_space<vmem>>, vector<4x256xf32>,
    %c0_173 = arith.constant 0 : index
    %c146 = arith.constant 146 : index
    %178 = vector.load %arg7[%c0_173, %c146] : memref<4x512xf32, #tpu.memory_space<vmem>>, vector<4x256xf32>
    %179 = vector.broadcast %14 : vector<1x256xf32> to vector<4x256xf32>
    %180 = arith.mulf %178, %179 : vector<4x256xf32>
    %c0_174 = arith.constant 0 : index
    %c0_175 = arith.constant 0 : index
    %181 = vector.load %arg6[%c0_174, %c0_175] : memref<4x256xf32, #tpu.memory_space<vmem>>, vector<4x256xf32>
    %c19 = arith.constant 19 : index
    %c0_176 = arith.constant 0 : index
    %c0_177 = arith.constant 0 : index
    %182 = vector.load %arg2[%c19, %c0_176, %c0_177] : memref<25x4x4xf32, #tpu.memory_space<vmem>>, vector<1x4x4xf32>
    %183 = vector.shape_cast %182 : vector<1x4x4xf32> to vector<4x4xf32>
    %cst_178 = arith.constant dense<0.000000e+00> : vector<4x256xf32>
    %184 = tpu.matmul %183, %180, %cst_178 {dimension_numbers = #tpu.dot_dimension_numbers<[1], [0], [0], [1], [0, 0, 1, 1], [], []>} : vector<4x4xf32>, vector<4x256xf32>, vector<4x256xf32> -> vector<4x256xf32>
    %185 = arith.addf %181, %184 : vector<4x256xf32>
    %c0_179 = arith.constant 0 : index
    %c0_180 = arith.constant 0 : index
    %186 = vector.load %arg6[%c0_179, %c0_180] : memref<4x256xf32, #tpu.memory_space<vmem>>, vector<4x256xf32>
    tpu.vector_store %arg6[%c0_179, %c0_180], %185 {strides = array<i32>} : memref<4x256xf32, #tpu.memory_space<vmem>>, vector<4x256xf32>,
    %c0_181 = arith.constant 0 : index
    %c158 = arith.constant 158 : index
    %187 = vector.load %arg7[%c0_181, %c158] : memref<4x512xf32, #tpu.memory_space<vmem>>, vector<4x256xf32>
    %188 = vector.broadcast %11 : vector<1x256xf32> to vector<4x256xf32>
    %189 = arith.mulf %187, %188 : vector<4x256xf32>
    %c0_182 = arith.constant 0 : index
    %c0_183 = arith.constant 0 : index
    %190 = vector.load %arg6[%c0_182, %c0_183] : memref<4x256xf32, #tpu.memory_space<vmem>>, vector<4x256xf32>
    %c20 = arith.constant 20 : index
    %c0_184 = arith.constant 0 : index
    %c0_185 = arith.constant 0 : index
    %191 = vector.load %arg2[%c20, %c0_184, %c0_185] : memref<25x4x4xf32, #tpu.memory_space<vmem>>, vector<1x4x4xf32>
    %192 = vector.shape_cast %191 : vector<1x4x4xf32> to vector<4x4xf32>
    %cst_186 = arith.constant dense<0.000000e+00> : vector<4x256xf32>
    %193 = tpu.matmul %192, %189, %cst_186 {dimension_numbers = #tpu.dot_dimension_numbers<[1], [0], [0], [1], [0, 0, 1, 1], [], []>} : vector<4x4xf32>, vector<4x256xf32>, vector<4x256xf32> -> vector<4x256xf32>
    %194 = arith.addf %190, %193 : vector<4x256xf32>
    %c0_187 = arith.constant 0 : index
    %c0_188 = arith.constant 0 : index
    %195 = vector.load %arg6[%c0_187, %c0_188] : memref<4x256xf32, #tpu.memory_space<vmem>>, vector<4x256xf32>
    tpu.vector_store %arg6[%c0_187, %c0_188], %194 {strides = array<i32>} : memref<4x256xf32, #tpu.memory_space<vmem>>, vector<4x256xf32>,
    %c0_189 = arith.constant 0 : index
    %c159 = arith.constant 159 : index
    %196 = vector.load %arg7[%c0_189, %c159] : memref<4x512xf32, #tpu.memory_space<vmem>>, vector<4x256xf32>
    %197 = vector.broadcast %12 : vector<1x256xf32> to vector<4x256xf32>
    %198 = arith.mulf %196, %197 : vector<4x256xf32>
    %c0_190 = arith.constant 0 : index
    %c0_191 = arith.constant 0 : index
    %199 = vector.load %arg6[%c0_190, %c0_191] : memref<4x256xf32, #tpu.memory_space<vmem>>, vector<4x256xf32>
    %c21 = arith.constant 21 : index
    %c0_192 = arith.constant 0 : index
    %c0_193 = arith.constant 0 : index
    %200 = vector.load %arg2[%c21, %c0_192, %c0_193] : memref<25x4x4xf32, #tpu.memory_space<vmem>>, vector<1x4x4xf32>
    %201 = vector.shape_cast %200 : vector<1x4x4xf32> to vector<4x4xf32>
    %cst_194 = arith.constant dense<0.000000e+00> : vector<4x256xf32>
    %202 = tpu.matmul %201, %198, %cst_194 {dimension_numbers = #tpu.dot_dimension_numbers<[1], [0], [0], [1], [0, 0, 1, 1], [], []>} : vector<4x4xf32>, vector<4x256xf32>, vector<4x256xf32> -> vector<4x256xf32>
    %203 = arith.addf %199, %202 : vector<4x256xf32>
    %c0_195 = arith.constant 0 : index
    %c0_196 = arith.constant 0 : index
    %204 = vector.load %arg6[%c0_195, %c0_196] : memref<4x256xf32, #tpu.memory_space<vmem>>, vector<4x256xf32>
    tpu.vector_store %arg6[%c0_195, %c0_196], %203 {strides = array<i32>} : memref<4x256xf32, #tpu.memory_space<vmem>>, vector<4x256xf32>,
    %c0_197 = arith.constant 0 : index
    %c160 = arith.constant 160 : index
    %205 = vector.load %arg7[%c0_197, %c160] : memref<4x512xf32, #tpu.memory_space<vmem>>, vector<4x256xf32>
    %c0_198 = arith.constant 0 : index
    %c0_199 = arith.constant 0 : index
    %206 = vector.load %arg6[%c0_198, %c0_199] : memref<4x256xf32, #tpu.memory_space<vmem>>, vector<4x256xf32>
    %c22 = arith.constant 22 : index
    %c0_200 = arith.constant 0 : index
    %c0_201 = arith.constant 0 : index
    %207 = vector.load %arg2[%c22, %c0_200, %c0_201] : memref<25x4x4xf32, #tpu.memory_space<vmem>>, vector<1x4x4xf32>
    %208 = vector.shape_cast %207 : vector<1x4x4xf32> to vector<4x4xf32>
    %cst_202 = arith.constant dense<0.000000e+00> : vector<4x256xf32>
    %209 = tpu.matmul %208, %205, %cst_202 {dimension_numbers = #tpu.dot_dimension_numbers<[1], [0], [0], [1], [0, 0, 1, 1], [], []>} : vector<4x4xf32>, vector<4x256xf32>, vector<4x256xf32> -> vector<4x256xf32>
    %210 = arith.addf %206, %209 : vector<4x256xf32>
    %c0_203 = arith.constant 0 : index
    %c0_204 = arith.constant 0 : index
    %211 = vector.load %arg6[%c0_203, %c0_204] : memref<4x256xf32, #tpu.memory_space<vmem>>, vector<4x256xf32>
    tpu.vector_store %arg6[%c0_203, %c0_204], %210 {strides = array<i32>} : memref<4x256xf32, #tpu.memory_space<vmem>>, vector<4x256xf32>,
    %c0_205 = arith.constant 0 : index
    %c161 = arith.constant 161 : index
    %212 = vector.load %arg7[%c0_205, %c161] : memref<4x512xf32, #tpu.memory_space<vmem>>, vector<4x256xf32>
    %213 = vector.broadcast %13 : vector<1x256xf32> to vector<4x256xf32>
    %214 = arith.mulf %212, %213 : vector<4x256xf32>
    %c0_206 = arith.constant 0 : index
    %c0_207 = arith.constant 0 : index
    %215 = vector.load %arg6[%c0_206, %c0_207] : memref<4x256xf32, #tpu.memory_space<vmem>>, vector<4x256xf32>
    %c23 = arith.constant 23 : index
    %c0_208 = arith.constant 0 : index
    %c0_209 = arith.constant 0 : index
    %216 = vector.load %arg2[%c23, %c0_208, %c0_209] : memref<25x4x4xf32, #tpu.memory_space<vmem>>, vector<1x4x4xf32>
    %217 = vector.shape_cast %216 : vector<1x4x4xf32> to vector<4x4xf32>
    %cst_210 = arith.constant dense<0.000000e+00> : vector<4x256xf32>
    %218 = tpu.matmul %217, %214, %cst_210 {dimension_numbers = #tpu.dot_dimension_numbers<[1], [0], [0], [1], [0, 0, 1, 1], [], []>} : vector<4x4xf32>, vector<4x256xf32>, vector<4x256xf32> -> vector<4x256xf32>
    %219 = arith.addf %215, %218 : vector<4x256xf32>
    %c0_211 = arith.constant 0 : index
    %c0_212 = arith.constant 0 : index
    %220 = vector.load %arg6[%c0_211, %c0_212] : memref<4x256xf32, #tpu.memory_space<vmem>>, vector<4x256xf32>
    tpu.vector_store %arg6[%c0_211, %c0_212], %219 {strides = array<i32>} : memref<4x256xf32, #tpu.memory_space<vmem>>, vector<4x256xf32>,
    %c0_213 = arith.constant 0 : index
    %c162 = arith.constant 162 : index
    %221 = vector.load %arg7[%c0_213, %c162] : memref<4x512xf32, #tpu.memory_space<vmem>>, vector<4x256xf32>
    %222 = vector.broadcast %14 : vector<1x256xf32> to vector<4x256xf32>
    %223 = arith.mulf %221, %222 : vector<4x256xf32>
    %c0_214 = arith.constant 0 : index
    %c0_215 = arith.constant 0 : index
    %224 = vector.load %arg6[%c0_214, %c0_215] : memref<4x256xf32, #tpu.memory_space<vmem>>, vector<4x256xf32>
    %c24 = arith.constant 24 : index
    %c0_216 = arith.constant 0 : index
    %c0_217 = arith.constant 0 : index
    %225 = vector.load %arg2[%c24, %c0_216, %c0_217] : memref<25x4x4xf32, #tpu.memory_space<vmem>>, vector<1x4x4xf32>
    %226 = vector.shape_cast %225 : vector<1x4x4xf32> to vector<4x4xf32>
    %cst_218 = arith.constant dense<0.000000e+00> : vector<4x256xf32>
    %227 = tpu.matmul %226, %223, %cst_218 {dimension_numbers = #tpu.dot_dimension_numbers<[1], [0], [0], [1], [0, 0, 1, 1], [], []>} : vector<4x4xf32>, vector<4x256xf32>, vector<4x256xf32> -> vector<4x256xf32>
    %228 = arith.addf %224, %227 : vector<4x256xf32>
    %c0_219 = arith.constant 0 : index
    %c0_220 = arith.constant 0 : index
    %229 = vector.load %arg6[%c0_219, %c0_220] : memref<4x256xf32, #tpu.memory_space<vmem>>, vector<4x256xf32>
    tpu.vector_store %arg6[%c0_219, %c0_220], %228 {strides = array<i32>} : memref<4x256xf32, #tpu.memory_space<vmem>>, vector<4x256xf32>,
    %c0_221 = arith.constant 0 : index
    %c0_222 = arith.constant 0 : index
    %230 = vector.load %arg6[%c0_221, %c0_222] : memref<4x256xf32, #tpu.memory_space<vmem>>, vector<4x256xf32>
    %c0_223 = arith.constant 0 : index
    %c0_224 = arith.constant 0 : index
    %c0_225 = arith.constant 0 : index
    %231 = vector.load %arg5[%c0_223, %c0_224, %c0_225] : memref<1x4x256xf32, #tpu.memory_space<vmem>>, vector<1x4x256xf32>
    %232 = vector.shape_cast %231 : vector<1x4x256xf32> to vector<4x256xf32>
    %233 = vector.shape_cast %230 : vector<4x256xf32> to vector<1x4x256xf32>
    tpu.vector_store %arg5[%c0_223, %c0_224, %c0_225], %233 {strides = array<i32>} : memref<1x4x256xf32, #tpu.memory_space<vmem>>, vector<1x4x256xf32>,
    return
  }
  func.func @transform_0(%arg0: i32) -> (i32, i32, i32) {
    %c0_i32 = arith.constant 0 : i32
    %c0_i32_0 = arith.constant 0 : i32
    %c0_i32_1 = arith.constant 0 : i32
    return %arg0, %c0_i32, %c0_i32_0 : i32, i32, i32
  }
  func.func @transform_1(%arg0: i32) -> (i32, i32, i32) {
    %c0_i32 = arith.constant 0 : i32
    %c0_i32_0 = arith.constant 0 : i32
    %c0_i32_1 = arith.constant 0 : i32
    %c0_i32_2 = arith.constant 0 : i32
    return %c0_i32, %c0_i32_0, %c0_i32_1 : i32, i32, i32
  }
  func.func @transform_2(%arg0: i32) -> (i32, i32) {
    %c0_i32 = arith.constant 0 : i32
    %c0_i32_0 = arith.constant 0 : i32
    %c0_i32_1 = arith.constant 0 : i32
    return %c0_i32, %c0_i32_0 : i32, i32
  }
  func.func @transform_3(%arg0: i32) -> (i32, i32) {
    %c0_i32 = arith.constant 0 : i32
    %c0_i32_0 = arith.constant 0 : i32
    %c0_i32_1 = arith.constant 0 : i32
    return %c0_i32, %c0_i32_0 : i32, i32
  }
  func.func @transform_4(%arg0: i32) -> (i32, i32, i32) {
    %c0_i32 = arith.constant 0 : i32
    %c0_i32_0 = arith.constant 0 : i32
    %c0_i32_1 = arith.constant 0 : i32
    return %arg0, %c0_i32, %c0_i32_0 : i32, i32, i32
  }
}

</mosaic_0001>

<bundles_post_ra>
// kernel: conv_attention_forward.1
= control target key start
LH: loop header
LB: loop body
LE: loop exit
PB: predicated region body
PF: predicated region fallthrough
CT: control target
= control target key end

     0   :  { %s3208_s15 = smov 0   ;;  %s3823_s0 = inlined_call_operand.vmem [shape: f32[2,4,256], index: 0, kind: input, shape index: {}]   ;;  %s3824_s1 = inlined_call_operand.vmem [shape: f32[25,4,4], index: 1, kind: input, shape index: {}]   ;;  %s3825_s2 = inlined_call_operand.vmem [shape: f32[4,1], index: 2, kind: input, shape index: {}]   ;;  %s3826_s3 = inlined_call_operand.vmem [shape: f32[5,256], index: 3, kind: input, shape index: {}]   ;;  %s3827_s4 = inlined_call_operand.vmem [shape: f32[2,4,256], index: 4, kind: output, shape index: {}]  }
   0x1 LB: > { %s2995_s16 = sadd.s32 4294967295, %s3154_s15   ;;  %p2999_p0 = scmp.ge.s32.totalorder %s3154_s15, 1  ;;  %s3154_s15 = sphi %s3208_s15, %s14_s15  }
   0x2   : > { %p162_p1 = scmp.lt.s32.totalorder %s3154_s15, 3 }
   0x4   : > { %p163_p2 = pnand %p2999_p0, %p162_p1 }
   0x5   : > { %s3157_s25 = smov (!%p163_p2), 97   ;;  %s3158_s26 = smov (!%p163_p2), 94  }
   0x6   : > { %166 = sbr.rel (%p163_p2) target bundleno = 590 (0x24e), region = 36  ;;  %p188_p3 = scmp.lt.s32.totalorder (!%p163_p2), %s2995_s16, 1 }
   0x7   : > { %s3159_s27 = smov (!%p163_p2), 98   ;;  %s3160_s28 = smov (!%p163_p2), 95  }
   0x8   : > { %s3161_s7 = smov (!%p163_p2), 111   ;;  %s3162_s8 = smov (!%p163_p2), 110  }
   0x9   : > { %s3163_s9 = smov (!%p163_p2), 113   ;;  %s3164_s10 = smov (!%p163_p2), 114  }
   0xa   : > { %s3165_s11 = smov (!%p163_p2), 126   ;;  %s3166_s12 = smov (!%p163_p2), 127  }
   0xb   : > { %v210_v0 = vlaneseq  ;;  %v3156_v1 = vmov 0.0   ;;  %v3005_v3 = vld [vmem:[%s3826_s3 + $0x3] ss:$8 sm:$0x3]  ;;  %s3850_s16 = smov (!%p188_p3, %s2995_s16), 1  ;;  %s3167_s13 = smov 1  }
   0xc   : > { %198 = vst [vmem:[#allocation3] sm:$0xf] %v3156_v1  ;;  %199 = vst [vmem:[#allocation3 + $0xc] sm:$0xf] %v3156_v1  ;;  %451 = vmatprep.mubr.f32.mxu1 %v3156_v1  ;;  %331 = vmatprep.mubr.f32.mxu0 %v3156_v1  ;;  %s3108_s29 = sshll.u32 %s3850_s16, 3  ;;  %s3168_s14 = smov 2  }
   0xd   : > { %v3220_v2 = vshrl.u32 %v210_v0, 7  ;;  %v216_v4 = vld [vmem:[%s3826_s3] ss:$8 sm:$0x3]  ;;  %s192_s6 = scalar_lea.vmem %s3823_s0, %s3108_s29  ;;  %s3169_s17 = smov 14   ;;  %vm3829_vm0 = vcmask 777216  }
   0xe   : > { %v3006_v5 = vld [vmem:[%s3826_s3 + $0x4] ss:$8 sm:$0x3]  ;;  %v3004_v8 = vld [vmem:[%s3826_s3 + $0x1] ss:$8 sm:$0x3] }
   0xf   : > { %v228_v6 = vsub.s32 0, %v3220_v2  ;;  %v232_v7 = vsub.s32 1, %v3220_v2  ;;  %v3252_v21 = vld [vmem:[%s192_s6] sm:$0xff]  ;;  %s3170_s18 = smov 15   ;;  %s3171_s19 = smov 17   ;;  %vm3830_vm1 = vcmask 793600  }
  0x10   : > { %201 = vst [vmem:[#allocation3 + $0x4] sm:$0xff] %v3252_v21  ;;  %s3172_s20 = smov 18   ;;  %s3173_s21 = smov 30   ;;  %vm3828_vm2 = vcmask 769024   ;;  %vm3831_vm3 = vcmask 801792   ;;  %vm3832_vm4 = vcmask 900096  }
  0x11   : > { %v571_v9 = vrot.slane %v3005_v3, %v228_v6  ;;  %v575_v10 = vrot.slane %v3005_v3, %v232_v7  ;;  %v229_v11 = vrot.slane %v216_v4, %v228_v6  ;;  %v233_v12 = vrot.slane %v216_v4, %v232_v7  ;;  %s3174_s22 = smov 31   ;;  %s3175_s23 = smov 34  }
  0x12   : > { %v691_v13 = vrot.slane %v3006_v5, %v228_v6  ;;  %v695_v14 = vrot.slane %v3006_v5, %v232_v7  ;;  %v350_v15 = vrot.slane %v3004_v8, %v228_v6  ;;  %v354_v16 = vrot.slane %v3004_v8, %v232_v7  ;;  %s3176_s24 = smov 33   ;;  %s3177_s30 = smov 32  }
  0x13   : > { %v576_v17 = vcombine.low %v571_v9, %v575_v10  ;;  %v234_v18 = vcombine.low %v229_v11, %v233_v12  ;;  %s3178_s5 = smov 16   ;;  %v1657_v4 = vld [vmem:[#allocation3 + $0xc] sm:$0xf]  ;;  %vm3833_vm5 = vcmask 908288   ;;  %vm1241_vm6 = vcmask 932864   ;;  %s3179_s6 = smov 112  }
  0x14   : > { %v696_v19 = vcombine.low %v691_v13, %v695_v14  ;;  %v355_v20 = vcombine.low %v350_v15, %v354_v16  ;;  %v1765_v8 = vld [vmem:[#allocation3 + $0xc] sm:$0xf]  ;;  %vm478_vm7 = vcmask 261120   ;;  %vm3834_vm8 = vcmask 924672  }
  0x15   : > { %577 = vrot.lane.b32.xlu1 %v576_v17, %s3157_s25  ;;  %235 = vrot.lane.b32.xlu0 %v234_v18, %s3158_s26  ;;  %v1873_v12 = vld [vmem:[#allocation3 + $0xc] sm:$0xf]  ;;  %vm1461_vm9 = vcmask 1039360   ;;  %vm1351_vm10 = vcmask 1031168   ;;  %vm1369_vm11 = vcmask 15360   ;;  %vm1039_vm12 = vcmask 130048  }
  0x16   : > { %v1981_v16 = vld [vmem:[#allocation3 + $0xc] sm:$0xf]  ;;  %vm1479_vm13 = vcmask 7168   ;;  %vm1149_vm14 = vcmask 121856   ;;  %vm1259_vm15 = vcmask 113664  }
  0x17   : > { %v3269_v22 = vld [vmem:[#allocation3] sm:$0xff]  ;;  %v465_v24 = vld [vmem:[#allocation3 + $0x8] sm:$0xf] }
  0x18   : > { %v471_v23 = vcombine.high %v3269_v22, %v3269_v22  ;;  %v1026_v25 = vld [vmem:[#allocation3 + $0x8] sm:$0xf] }
  0x19   : > { %697 = vrot.lane.b32.xlu1 %v696_v19, %s3159_s27  ;;  %356 = vrot.lane.b32.xlu0 %v355_v20, %s3160_s28  ;;  %v224_v28 = vld [vmem:[#allocation3 + $0x8] sm:$0xf] }
  0x1a   : > { %v686_v32 = vld [vmem:[#allocation3 + $0x8] sm:$0xf] }
  0x1b   : > { %v345_v34 = vld [vmem:[#allocation3 + $0x8] sm:$0xf] }
  0x1c   : > { %v566_v39 = vld [vmem:[#allocation3 + $0x8] sm:$0xf] }
  0x1d   : > { %917 = vrot.lane.b32.xlu1 %v355_v20, %s3161_s7  ;;  %807 = vrot.lane.b32.xlu0 %v234_v18, %s3162_s8  ;;  %v916_v41 = vld [vmem:[#allocation3 + $0x8] sm:$0xf] }
  0x1e   : > { %v806_v45 = vld [vmem:[#allocation3 + $0x8] sm:$0xf] }
  0x1f   : > { %v1127_v50 = vld [vmem:[#allocation3 + $0x8] sm:$0xf] }
  0x20   : > { %v1237_v54 = vld [vmem:[#allocation3 + $0x8] sm:$0xf] }
  0x21   : > { %1128 = vrot.lane.b32.xlu0 %v576_v17, %s3163_s9  ;;  %1238 = vrot.lane.b32.xlu1 %v696_v19, %s3164_s10  ;;  %v1347_v58 = vld [vmem:[#allocation3 + $0x8] sm:$0xf] }
  0x22   : > { %v1457_v62 = vld [vmem:[#allocation3 + $0x8] sm:$0xf] }
  0x25   : > { %1348 = vrot.lane.b32.xlu0 %v234_v18, %s3165_s11  ;;  %1458 = vrot.lane.b32.xlu1 %v355_v20, %s3166_s12 }
  0x29   : > { %1658 = vrot.lane.b32.xlu0 %v576_v17, %s3167_s13  ;;  %1766 = vrot.lane.b32.xlu1 %v696_v19, %s3168_s14 }
  0x2d   : > { %1874 = vrot.lane.b32.xlu0 %v234_v18, %s3169_s17  ;;  %1982 = vrot.lane.b32.xlu1 %v355_v20, %s3170_s18 }
  0x31   : > { %2191 = vrot.lane.b32.xlu0 %v576_v17, %s3171_s19  ;;  %2299 = vrot.lane.b32.xlu1 %v696_v19, %s3172_s20 }
  0x35   : > { %2407 = vrot.lane.b32.xlu0 %v234_v18, %s3173_s21  ;;  %2515 = vrot.lane.b32.xlu1 %v355_v20, %s3174_s22 }
  0x39   : > { %2832 = vrot.lane.b32.xlu1 %v696_v19, %s3175_s23  ;;  %2724 = vrot.lane.b32.xlu0 %v576_v17, %s3176_s24 }
  0x3d   : > { %476 = vrot.lane.b32.xlu1 %v465_v24, %s3177_s30  ;;  %474 = vrot.lane.b32.xlu0 %v471_v23, %s3177_s30 }
  0x41   : > { %1035 = vrot.lane.b32.xlu1 %v471_v23, %s3178_s5  ;;  %472 = vrot.lane.b32.xlu0 %v3269_v22, %s3177_s30 }
  0x45   : > { %1033 = vrot.lane.b32.xlu1 %v3269_v22, %s3178_s5  ;;  %1037 = vrot.lane.b32.xlu0 %v1026_v25, %s3178_s5 }
  0x87   : > { %v3277_v26 = vpop.permute.xlu1 %577  ;;  %v3279_v27 = vpop.permute.xlu0 %235 }
  0x88   : > { %v237_v29 = vrot.slane %v3279_v27, 4  ;;  %v579_v43 = vrot.slane %v3277_v26, 4 }
  0x8a   : > { %v243_v30 = vmul.f32 %v237_v29, %v224_v28  ;;  %v585_v46 = vmul.f32 %v579_v43, %v566_v39  ;;  %v581_v28 = vsel %vm3830_vm1, %v579_v43, %v3277_v26  ;;  %vm598_vm1 = vcmask 252928  }
  0x8b   : > { %v3284_v31 = vpop.permute.xlu1 %697  ;;  %v357_v33 = vpop.permute.xlu0 %356 }
  0x8c   : > { %v699_v35 = vrot.slane %v3284_v31, 4  ;;  %v358_v36 = vrot.slane %v357_v33, 4  ;;  %253 = vrot.lane.b32.xlu1 %v243_v30, %s3175_s23  ;;  %v239_v30 = vsel %vm3828_vm2, %v237_v29, %v3279_v27  ;;  %vm718_vm2 = vcmask 244736  }
  0x8d   : > { %v242_v26 = vmul.f32 %v3269_v22, %v239_v30 }
  0x8e   : > { %v705_v37 = vmul.f32 %v699_v35, %v686_v32  ;;  %v364_v38 = vmul.f32 %v358_v36, %v345_v34  ;;  %v360_v19 = vsel %vm3829_vm0, %v358_v36, %v357_v33  ;;  %v584_v34 = vmul.f32 %v581_v28, %v3269_v22  ;;  %v2298_v28 = vld [vmem:[#allocation3 + $0xc] sm:$0xf] }
  0x8f   : > { %v3290_v40 = vpop.permute.xlu1 %917  ;;  %v3292_v42 = vpop.permute.xlu0 %807  ;;  %v3359_v25 = vmul.f32 %v3269_v22, %v360_v19  ;;  %v701_v27 = vsel %vm3831_vm3, %v699_v35, %v3284_v31  ;;  %vm828_vm0 = vcmask 146432   ;;  %vm255_vm3 = vcmask 277504  }
  0x90   : > { %v919_v44 = vrot.slane %v3290_v40, 4  ;;  %375 = vrot.lane.b32.xlu0 %v364_v38, %s3176_s24  ;;  %716 = vrot.lane.b32.xlu1 %v705_v37, %s3173_s21  ;;  %v809_v48 = vrot.slane %v3292_v42, 4  ;;  %v704_v38 = vmul.f32 %v701_v27, %v3269_v22 }
  0x92   : > { %v925_v47 = vmul.f32 %v919_v44, %v916_v41  ;;  %v815_v52 = vmul.f32 %v809_v48, %v806_v45  ;;  %v811_v29 = vsel %vm3832_vm4, %v809_v48, %v3292_v42  ;;  %v921_v35 = vsel %vm3833_vm5, %v919_v44, %v3290_v40 }
  0x93   : > { %v3301_v49 = vpop.permute.xlu0 %1128  ;;  %v3303_v51 = vpop.permute.xlu1 %1238  ;;  %v814_v31 = vmul.f32 %v811_v29, %v3269_v22  ;;  %v924_v45 = vmul.f32 %v921_v35, %v3269_v22  ;;  %vm377_vm4 = vcmask 269312   ;;  %vm262_vm5 = vcmask 1043456  }
  0x94   : > { %v1130_v53 = vrot.slane %v3301_v49, 4  ;;  %596 = vrot.lane.b32.xlu0 %v585_v46, %s3174_s22  ;;  %936 = vrot.lane.b32.xlu1 %v925_v47, %s3171_s19  ;;  %v1240_v56 = vrot.slane %v3303_v51, 4 }
  0x96   : > { %v1136_v55 = vmul.f32 %v1130_v53, %v1127_v50  ;;  %v1246_v60 = vmul.f32 %v1240_v56, %v1237_v54  ;;  %v1242_v39 = vsel %vm1241_vm6, %v1240_v56, %v3303_v51  ;;  %v1132_v44 = vsel %vm3834_vm8, %v1130_v53, %v3301_v49 }
  0x97   : > { %v3313_v57 = vpop.permute.xlu0 %1348  ;;  %v3315_v59 = vpop.permute.xlu1 %1458  ;;  %v1245_v40 = vmul.f32 %v1242_v39, %v3269_v22  ;;  %v1135_v50 = vmul.f32 %v1132_v44, %v3269_v22  ;;  %vm258_vm8 = vcmask 31744  }
  0x98   : > { %v1350_v61 = vrot.slane %v3313_v57, 4  ;;  %826 = vrot.lane.b32.xlu0 %v815_v52, %s3172_s20  ;;  %1147 = vrot.lane.b32.xlu1 %v1136_v55, %s3170_s18  ;;  %v1460_v0 = vrot.slane %v3315_v59, 4 }
  0x9a   : > { %v1356_v63 = vmul.f32 %v1350_v61, %v1347_v58  ;;  %v1466_v6 = vmul.f32 %v1460_v0, %v1457_v62  ;;  %v1462_v46 = vsel %vm1461_vm9, %v1460_v0, %v3315_v59  ;;  %v1352_v51 = vsel %vm1351_vm10, %v1350_v61, %v3313_v57 }
  0x9b   : > { %v3325_v3 = vpop.permute.xlu0 %1658  ;;  %v3327_v5 = vpop.permute.xlu1 %1766  ;;  %v1465_v49 = vmul.f32 %v1462_v46, %v3269_v22  ;;  %v1355_v56 = vmul.f32 %v1352_v51, %v3269_v22  ;;  %v591_v0 = vcombine.high %v584_v34, %v584_v34 }
  0x9c   : > { %v1660_v7 = vrot.slane %v3325_v3, 4  ;;  %1257 = vrot.lane.b32.xlu0 %v1246_v60, %s3169_s17  ;;  %1367 = vrot.lane.b32.xlu1 %v1356_v63, %s3168_s14  ;;  %v1768_v10 = vrot.slane %v3327_v5, 4  ;;  %v370_v63 = vcombine.high %v3359_v25, %v3359_v25 }
  0x9e   : > { %v1665_v9 = vmul.f32 %v1660_v7, %v1657_v4  ;;  %v1773_v14 = vmul.f32 %v1768_v10, %v1765_v8  ;;  %v1769_v52 = vsel %vm1369_vm11, %v1768_v10, %v3327_v5  ;;  %v1661_v58 = vsel %vm1479_vm13, %v1660_v7, %v3325_v3 }
  0x9f   : > { %v3337_v11 = vpop.permute.xlu0 %1874  ;;  %v3339_v13 = vpop.permute.xlu1 %1982  ;;  %v1772_v57 = vmul.f32 %v1769_v52, %v3252_v21  ;;  %v1664_v60 = vmul.f32 %v1661_v58, %v3252_v21  ;;  %v248_v3 = vcombine.high %v242_v26, %v242_v26  ;;  %v821_v4 = vcombine.high %v814_v31, %v814_v31  ;;  %v2723_v52 = vld [vmem:[#allocation3 + $0xc] sm:$0xf] }
  0xa0   : > { %v1876_v15 = vrot.slane %v3337_v11, 4  ;;  %1477 = vrot.lane.b32.xlu0 %v1466_v6, %s3167_s13  ;;  %1676 = vrot.lane.b32.xlu1 %v1665_v9, %s3166_s12  ;;  %v1984_v18 = vrot.slane %v3339_v13, 4  ;;  %v711_v5 = vcombine.high %v704_v38, %v704_v38  ;;  %v1252_v6 = vcombine.high %v1245_v40, %v1245_v40 }
  0xa1   : > { %v931_v7 = vcombine.high %v924_v45, %v924_v45  ;;  %v1472_v8 = vcombine.high %v1465_v49, %v1465_v49  ;;  %v1142_v9 = vcombine.high %v1135_v50, %v1135_v50 }
  0xa2   : > { %v1881_v17 = vmul.f32 %v1876_v15, %v1873_v12  ;;  %v1989_v24 = vmul.f32 %v1984_v18, %v1981_v16  ;;  %v1985_v59 = vsel %vm1149_vm14, %v1984_v18, %v3339_v13  ;;  %v1877_v61 = vsel %vm1259_vm15, %v1876_v15, %v3337_v11 }
  0xa3   : > { %v3350_v20 = vpop.permute.xlu0 %2191  ;;  %v3352_v23 = vpop.permute.xlu1 %2299  ;;  %v1988_v22 = vmul.f32 %v1985_v59, %v3252_v21  ;;  %v1880_v62 = vmul.f32 %v1877_v61, %v3252_v21  ;;  %v1779_v11 = vcombine.high %v1772_v57, %v1772_v57  ;;  %v1362_v12 = vcombine.high %v1355_v56, %v1355_v56 }
  0xa4   : > { %1784 = vrot.lane.b32.xlu0 %v1773_v14, %s3165_s11  ;;  %1892 = vrot.lane.b32.xlu1 %v1881_v17, %s3164_s10  ;;  %v2193_v10 = vrot.slane %v3350_v20, 4  ;;  %v1671_v15 = vcombine.high %v1664_v60, %v1664_v60  ;;  %v2089_v17 = vld [vmem:[#allocation3 + $0xc] sm:$0xf] }
  0xa5   : > { %v1995_v14 = vcombine.high %v1988_v22, %v1988_v22  ;;  %v1887_v18 = vcombine.high %v1880_v62, %v1880_v62 }
  0xa7   : > { %v3367_v32 = vpop.permute.xlu0 %2407  ;;  %v3369_v33 = vpop.permute.xlu1 %2515 }
  0xa8   : > { %2000 = vrot.lane.b32.xlu0 %v1989_v24, %s3163_s9  ;;  %371 = vrot.lane.b32.xlu1 %v3359_v25, %s3176_s24  ;;  %v3482_v24 = vcombine.high %v3252_v21, %v3252_v21  ;;  %v2301_v25 = vrot.slane %v3352_v23, 4  ;;  %v2517_v39 = vrot.slane %v3369_v33, 4 }
  0xaa   : > { %v2306_v27 = vmul.f32 %v2301_v25, %v2298_v28 }
  0xab   : > { %v3384_v36 = vpop.permute.xlu1 %2832  ;;  %v3386_v37 = vpop.permute.xlu0 %2724 }
  0xac   : > { %592 = vrot.lane.b32.xlu1 %v584_v34, %s3174_s22  ;;  %249 = vrot.lane.b32.xlu0 %v242_v26, %s3175_s23  ;;  %v2190_v34 = vld [vmem:[#allocation3 + $0xc] sm:$0xf]  ;;  %v2302_v26 = vsel %vm828_vm0, %v2301_v25, %v3352_v23 }
  0xad   : > { %v2406_v23 = vld [vmem:[#allocation3 + $0xc] sm:$0xf] }
  0xaf   : > { %v477_v41 = vpop.permute.xlu1 %476  ;;  %v475_v42 = vpop.permute.xlu0 %474 }
  0xb0   : > { %822 = vrot.lane.b32.xlu1 %v814_v31, %s3172_s20  ;;  %712 = vrot.lane.b32.xlu0 %v704_v38, %s3173_s21  ;;  %v3403_v43 = vsel %vm478_vm7, %v475_v42, %v477_v41  ;;  %v2198_v38 = vmul.f32 %v2193_v10, %v2190_v34  ;;  %v2305_v31 = vmul.f32 %v2302_v26, %v3252_v21  ;;  %v2514_v41 = vld [vmem:[#allocation3 + $0xc] sm:$0xf] }
  0xb1   : > { %v2522_v44 = vmul.f32 %v2517_v39, %v2514_v41 }
  0xb3   : > { %v473_v47 = vpop.permute.xlu0 %472  ;;  %v3430_v53 = vpop.permute.xlu1 %1035 }
  0xb4   : > { %1253 = vrot.lane.b32.xlu1 %v1245_v40, %s3169_s17  ;;  %932 = vrot.lane.b32.xlu0 %v924_v45, %s3171_s19  ;;  %v3418_v48 = vsel %vm478_vm7, %v473_v47, %v475_v42  ;;  %vm938_vm7 = vcmask 138240   ;;  %v2518_v42 = vsel %vm598_vm1, %v2517_v39, %v3369_v33 }
  0xb5   : > { %v2194_v13 = vsel %vm938_vm7, %v2193_v10, %v3350_v20  ;;  %v2409_v20 = vrot.slane %v3367_v32, 4  ;;  %v2521_v40 = vmul.f32 %v2518_v42, %v3252_v21 }
  0xb6   : > { %v2197_v16 = vmul.f32 %v2194_v13, %v3252_v21 }
  0xb7   : > { %v1038_v54 = vpop.permute.xlu0 %1037  ;;  %v2410_v30 = vsel %vm718_vm2, %v2409_v20, %v3367_v32  ;;  %v2312_v32 = vcombine.high %v2305_v31, %v2305_v31  ;;  %v2414_v45 = vmul.f32 %v2409_v20, %v2406_v23  ;;  %v3508_v46 = vpop.permute.xlu1 %1033  ;;  %v2528_v47 = vcombine.high %v2521_v40, %v2521_v40 }
  0xb8   : > { %1473 = vrot.lane.b32.xlu1 %v1465_v49, %s3167_s13  ;;  %1143 = vrot.lane.b32.xlu0 %v1135_v50, %s3170_s18  ;;  %v3436_v55 = vsel %vm1039_vm12, %v3430_v53, %v1038_v54  ;;  %v2204_v19 = vcombine.high %v2197_v16, %v2197_v16  ;;  %v2413_v29 = vmul.f32 %v2410_v30, %v3252_v21  ;;  %v2834_v50 = vrot.slane %v3384_v36, 4 }
  0xb9   : > { %v2726_v49 = vrot.slane %v3386_v37, 4 }
  0xba   : > { %v2420_v35 = vcombine.high %v2413_v29, %v2413_v29  ;;  %v2835_v51 = vsel %vm255_vm3, %v2834_v50, %v3384_v36 }
  0xbb   : > { %v2727_v54 = vsel %vm377_vm4, %v2726_v49, %v3386_v37  ;;  %v2731_v59 = vmul.f32 %v2726_v49, %v2723_v52 }
  0xbc   : > { %1780 = vrot.lane.b32.xlu1 %v1772_v57, %s3165_s11  ;;  %1363 = vrot.lane.b32.xlu0 %v1355_v56, %s3168_s14  ;;  %v2622_v56 = vld [vmem:[#allocation3 + $0xc] sm:$0xf]  ;;  %v2838_v57 = vmul.f32 %v2835_v51, %v3252_v21  ;;  %v2730_v58 = vmul.f32 %v2727_v54, %v3252_v21  ;;  %v3026_v54 = vld [vmem:[%s3824_s1 + $0x14] sm:$0xf] }
  0xbe   : > { %v2845_v37 = vcombine.high %v2838_v57, %v2838_v57 }
  0xc0   : > { %1996 = vrot.lane.b32.xlu1 %v1988_v22, %s3163_s9  ;;  %1672 = vrot.lane.b32.xlu0 %v1664_v60, %s3166_s12 }
  0xc4   : > { %373 = vrot.lane.b32.xlu1 %v370_v63, %s3176_s24  ;;  %1888 = vrot.lane.b32.xlu0 %v1880_v62, %s3164_s10  ;;  %v2737_v62 = vcombine.high %v2730_v58, %v2730_v58  ;;  %v3181_v63 = vmov 0  }
  0xc5   : > { %3145 = vset.pattern.permute.xlu0 %v3181_v63  ;;  %v3042_v63 = vld [vmem:[%s3824_s1 + $0x24] sm:$0xf] }
  0xc8   : > { %594 = vrot.lane.b32.xlu1 %v591_v0, %s3174_s22  ;;  %251 = vrot.lane.b32.xlu0 %v248_v3, %s3175_s23 }
  0xcc   : > { %824 = vrot.lane.b32.xlu1 %v821_v4, %s3172_s20  ;;  %714 = vrot.lane.b32.xlu0 %v711_v5, %s3173_s21  ;;  %v2831_v4 = vld [vmem:[#allocation3 + $0xc] sm:$0xf] }
  0xcd   : > { %v2839_v5 = vmul.f32 %v2834_v50, %v2831_v4 }
  0xd0   : > { %1255 = vrot.lane.b32.xlu1 %v1252_v6, %s3169_s17  ;;  %934 = vrot.lane.b32.xlu0 %v931_v7, %s3171_s19 }
  0xd4   : > { %1475 = vrot.lane.b32.xlu1 %v1472_v8, %s3167_s13  ;;  %1145 = vrot.lane.b32.xlu0 %v1142_v9, %s3170_s18  ;;  %v202_v8 = vld [vmem:[%s3825_s2] sm:$0xf] }
  0xd8   : > { %1782 = vrot.lane.b32.xlu1 %v1779_v11, %s3165_s11  ;;  %1365 = vrot.lane.b32.xlu0 %v1362_v12, %s3168_s14 }
  0xdc   : > { %1998 = vrot.lane.b32.xlu1 %v1995_v14, %s3163_s9  ;;  %1674 = vrot.lane.b32.xlu0 %v1671_v15, %s3166_s12  ;;  %s197_s12 = scalar_lea.vmem %s3827_s4, %s3108_s29 }
  0xe0   : > { %2100 = vrot.lane.b32.xlu1 %v2089_v17, %s3179_s6  ;;  %1890 = vrot.lane.b32.xlu0 %v1887_v18, %s3164_s10 }
  0xe4   : > { %2207 = vrot.lane.b32.xlu1 %v2204_v19, %s3161_s7  ;;  %2098 = vrot.lane.b32.xlu0 %v3482_v24, %s3179_s6 }
  0xe8   : > { %2205 = vrot.lane.b32.xlu1 %v2197_v16, %s3161_s7  ;;  %2096 = vrot.lane.b32.xlu0 %v3252_v21, %s3179_s6 }
  0xec   : > { %2317 = vrot.lane.b32.xlu1 %v2306_v27, %s3162_s8  ;;  %2209 = vrot.lane.b32.xlu0 %v2198_v38, %s3161_s7  ;;  %s3180_s7 = smov 96  }
  0xf0   : > { %2423 = vrot.lane.b32.xlu1 %v2420_v35, %s3159_s27  ;;  %2315 = vrot.lane.b32.xlu0 %v2312_v32, %s3162_s8  ;;  %v3010_v32 = vld [vmem:[%s3824_s1 + $0x4] sm:$0xf] }
  0xf4   : > { %2421 = vrot.lane.b32.xlu1 %v2413_v29, %s3159_s27  ;;  %2313 = vrot.lane.b32.xlu0 %v2305_v31, %s3162_s8 }
  0xf8   : > { %2533 = vrot.lane.b32.xlu1 %v2522_v44, %s3157_s25  ;;  %2425 = vrot.lane.b32.xlu0 %v2414_v45, %s3159_s27  ;;  %v3018_v44 = vld [vmem:[%s3824_s1 + $0xc] sm:$0xf] }
  0xfc   : > { %2631 = vrot.lane.b32.xlu1 %v3482_v24, %s3180_s7  ;;  %2531 = vrot.lane.b32.xlu0 %v2528_v47, %s3157_s25  ;;  %v245_v47 = vld [vmem:[%s3824_s1] sm:$0xf] }
  0xfe   : > { %v3514_v33 = vpop.permute.xlu1 %253 }
 0x100   : > { %2629 = vrot.lane.b32.xlu1 %v3252_v21, %s3180_s7  ;;  %2529 = vrot.lane.b32.xlu0 %v2521_v40, %s3157_s25 }
 0x102   : > { %v376_v60 = vpop.permute.xlu0 %375  ;;  %v3524_v22 = vpop.permute.xlu1 %716 }
 0x104   : > { %2742 = vrot.lane.b32.xlu1 %v2731_v59, %s3160_s28  ;;  %2633 = vrot.lane.b32.xlu0 %v2622_v56, %s3180_s7 }
 0x106   : > { %v597_v36 = vpop.permute.xlu0 %596  ;;  %v3527_v61 = vpop.permute.xlu1 %936 }
 0x108   : > { %2848 = vrot.lane.b32.xlu1 %v2845_v37, %s3158_s26  ;;  %2740 = vrot.lane.b32.xlu0 %v2737_v62, %s3160_s28 }
 0x10a   : > { %v827_v0 = vpop.permute.xlu0 %826  ;;  %v3531_v3 = vpop.permute.xlu1 %1147 }
 0x10c   : > { %2846 = vrot.lane.b32.xlu1 %v2838_v57, %s3158_s26  ;;  %2738 = vrot.lane.b32.xlu0 %v2730_v58, %s3160_s28  ;;  %v1040_v57 = vsel %vm1039_vm12, %v3508_v46, %v3430_v53  ;;  %v3034_v53 = vld [vmem:[%s3824_s1 + $0x1c] sm:$0xf]  ;;  %vm3843_vm12 = vcmask 793600  }
 0x10e   : > { %v3535_v6 = vpop.permute.xlu0 %1257  ;;  %v3537_v7 = vpop.permute.xlu1 %1367 }
 0x110   : > { %2850 = vrot.lane.b32.xlu0 %v2839_v5, %s3158_s26 }
 0x112   : > { %v3543_v9 = vpop.permute.xlu0 %1477  ;;  %v3545_v10 = vpop.permute.xlu1 %1676 }
 0x114   : > { %205 = vperm.xlu0 %3145, %v202_v8  }
 0x116   : > { %v3547_v11 = vpop.permute.xlu0 %1784  ;;  %v3549_v12 = vpop.permute.xlu1 %1892 }
 0x11a   : > { %v3551_v13 = vpop.permute.xlu0 %2000  ;;  %v372_v14 = vpop.permute.xlu1 %371 }
 0x11e   : > { %v593_v15 = vpop.permute.xlu1 %592  ;;  %v250_v16 = vpop.permute.xlu0 %249 }
 0x122   : > { %v823_v17 = vpop.permute.xlu1 %822  ;;  %v713_v18 = vpop.permute.xlu0 %712 }
 0x126   : > { %v3553_v19 = vpop.permute.xlu1 %1253  ;;  %v3555_v20 = vpop.permute.xlu0 %932 }
 0x12a   : > { %v3557_v25 = vpop.permute.xlu1 %1473  ;;  %v3559_v28 = vpop.permute.xlu0 %1143 }
 0x12e   : > { %v3561_v30 = vpop.permute.xlu1 %1780  ;;  %v3563_v34 = vpop.permute.xlu0 %1363 }
 0x132   : > { %v3565_v26 = vpop.permute.xlu1 %1996  ;;  %v3567_v27 = vpop.permute.xlu0 %1672 }
 0x136   : > { %v374_v29 = vpop.permute.xlu1 %373  ;;  %v3569_v38 = vpop.permute.xlu0 %1888 }
 0x137   : > { %v379_v31 = vsel %vm377_vm4, %v374_v29, %v376_v60  ;;  %v378_v35 = vsel %vm377_vm4, %v372_v14, %v374_v29 }
 0x138   : > { %3011 = vmatprep.subr.msk.mxu1 %vm262_vm5, %v379_v31 }
 0x139   : > { %3012 = vmatpush1.msk.msra.mxu1 %vm262_vm5, %v378_v35  ;;  %v3062_v35 = vld [vmem:[%s3824_s1 + $0x38] sm:$0xf] }
 0x13a   : > { %3013 = vmatmul.mubr.msk.f32.vlgmr.msra.gmra.mxu1 %vm258_vm8, %v3010_v32  ;;  %v595_v39 = vpop.permute.xlu1 %594  ;;  %v252_v23 = vpop.permute.xlu0 %251 }
 0x13b   : > { %v599_v41 = vsel %vm598_vm1, %v593_v15, %v595_v39  ;;  %v600_v42 = vsel %vm598_vm1, %v595_v39, %v597_v36  ;;  %v257_v45 = vsel %vm255_vm3, %v252_v23, %v3514_v33  ;;  %v256_v40 = vsel %vm255_vm3, %v250_v16, %v252_v23  ;;  %672 = vmatprep.mubr.f32.mxu1 %v3156_v1 }
 0x13c   : > { %3007 = vmatprep.subr.msk.mxu0 %vm262_vm5, %v257_v45  ;;  %3019 = vmatprep.subr.msk.mxu1 %vm262_vm5, %v600_v42  ;;  %vm3835_vm1 = vcmask 924672   ;;  %vm3837_vm3 = vcmask 908288  }
 0x13d   : > { %3008 = vmatpush1.msk.msra.mxu0 %vm262_vm5, %v256_v40  ;;  %3020 = vmatpush1.msk.msra.mxu1 %vm262_vm5, %v599_v41  ;;  %v3070_v41 = vld [vmem:[%s3824_s1 + $0x40] sm:$0xf]  ;;  %vm3838_vm4 = vmmov %vm3837_vm3 }
 0x13e   : > { %3021 = vmatmul.mubr.msk.f32.vlgmr.msra.gmra.mxu1 %vm258_vm8, %v3018_v44  ;;  %v825_v50 = vpop.permute.xlu1 %824  ;;  %3009 = vmatmul.mubr.msk.f32.vlgmr.msra.gmra.mxu0 %vm258_vm8, %v245_v47  ;;  %v715_v49 = vpop.permute.xlu0 %714  ;;  %v3078_v44 = vld [vmem:[%s3824_s1 + $0x48] sm:$0xf] }
 0x13f   : > { %v829_v33 = vsel %vm828_vm0, %v823_v17, %v825_v50  ;;  %v830_v51 = vsel %vm828_vm0, %v825_v50, %v827_v0  ;;  %3015 = vmatprep.subr.msk.mxu0 %vm262_vm5, %v3403_v43  ;;  %v720_v52 = vsel %vm718_vm2, %v715_v49, %v3524_v22  ;;  %552 = vmatprep.mubr.f32.mxu0 %v3156_v1  ;;  %v3014_v43 = vld [vmem:[%s3824_s1 + $0x8] sm:$0xf]  ;;  %v3030_v0 = vld [vmem:[%s3824_s1 + $0x18] sm:$0xf]  ;;  %vm2102_vm0 = vcmask 916480  }
 0x140   : > { %3016 = vmatpush1.msk.msra.mxu0 %vm262_vm5, %v3418_v48  ;;  %3027 = vmatprep.subr.msk.mxu1 %vm262_vm5, %v830_v51  ;;  %v719_v59 = vsel %vm718_vm2, %v713_v18, %v715_v49  ;;  %vm3836_vm2 = vmmov %vm3835_vm1 }
 0x141   : > { %3023 = vmatprep.subr.msk.mxu0 %vm262_vm5, %v720_v52  ;;  %3028 = vmatpush1.msk.msra.mxu1 %vm262_vm5, %v829_v33  ;;  %v3082_v52 = vld [vmem:[%s3824_s1 + $0x4c] sm:$0xf] }
 0x142   : > { %902 = vmatprep.mubr.f32.mxu1 %v3156_v1  ;;  %v1256_v56 = vpop.permute.xlu1 %1255  ;;  %v935_v48 = vpop.permute.xlu0 %934  ;;  %3035 = vmatprep.subr.msk.mxu1 %vm262_vm5, %v3436_v55  ;;  %v3022_v55 = vld [vmem:[%s3824_s1 + $0x10] sm:$0xf] }
 0x143   : > { %3029 = vmatmul.mubr.msk.f32.vlgmr.msra.gmra.mxu1 %vm258_vm8, %v3026_v54  ;;  %v1261_v58 = vsel %vm1259_vm15, %v1256_v56, %v3535_v6  ;;  %3017 = vmatmul.mubr.msk.f32.vlgmr.msra.gmra.mxu0 %vm258_vm8, %v3014_v43  ;;  %v940_v60 = vsel %vm938_vm7, %v935_v48, %v3527_v61  ;;  %v1260_v37 = vsel %vm1259_vm15, %v3553_v19, %v1256_v56  ;;  %vm3845_vm15 = vcmask 777216  }
 0x144   : > { %3036 = vmatpush1.msk.msra.mxu1 %vm262_vm5, %v1040_v57  ;;  %3024 = vmatpush1.msk.msra.mxu0 %vm262_vm5, %v719_v59  ;;  %v939_v62 = vsel %vm938_vm7, %v3555_v20, %v935_v48  ;;  %v3086_v57 = vld [vmem:[%s3824_s1 + $0x50] sm:$0xf]  ;;  %vm3846_vm7 = vmmov %vm3845_vm15 }
 0x145   : > { %3043 = vmatprep.subr.msk.mxu1 %vm262_vm5, %v1261_v58  ;;  %3031 = vmatprep.subr.msk.mxu0 %vm262_vm5, %v940_v60 }
 0x146   : > { %792 = vmatprep.mubr.f32.mxu0 %v3156_v1  ;;  %v1476_v46 = vpop.permute.xlu1 %1475  ;;  %v1146_v22 = vpop.permute.xlu0 %1145  ;;  %1113 = vmatprep.mubr.f32.mxu1 %v3156_v1 }
 0x147   : > { %v1481_v36 = vsel %vm1479_vm13, %v1476_v46, %v3543_v9  ;;  %v1151_v61 = vsel %vm1149_vm14, %v1146_v22, %v3531_v3  ;;  %3037 = vmatmul.mubr.msk.f32.vlgmr.msra.gmra.mxu1 %vm258_vm8, %v3034_v53  ;;  %3025 = vmatmul.mubr.msk.f32.vlgmr.msra.gmra.mxu0 %vm258_vm8, %v3022_v55  ;;  %v1480_v5 = vsel %vm1479_vm13, %v3557_v25, %v1476_v46  ;;  %v3038_v9 = vld [vmem:[%s3824_s1 + $0x20] sm:$0xf]  ;;  %vm3844_vm13 = vmmov %vm3843_vm12 }
 0x148   : > { %3044 = vmatpush1.msk.msra.mxu1 %vm262_vm5, %v1260_v37  ;;  %3032 = vmatpush1.msk.msra.mxu0 %vm262_vm5, %v939_v62  ;;  %v1150_v6 = vsel %vm1149_vm14, %v3559_v28, %v1146_v22  ;;  %v3058_v28 = vld [vmem:[%s3824_s1 + $0x34] sm:$0xf]  ;;  %vm2635_vm14 = vcmask 785408  }
 0x149   : > { %3039 = vmatprep.subr.msk.mxu0 %vm262_vm5, %v1151_v61  ;;  %3051 = vmatprep.subr.msk.mxu1 %vm262_vm5, %v1481_v36  ;;  %v3090_v22 = vld [vmem:[%s3824_s1 + $0x54] sm:$0xf] }
 0x14a   : > { %v1783_v3 = vpop.permute.xlu1 %1782  ;;  %v1366_v4 = vpop.permute.xlu0 %1365  ;;  %1012 = vmatprep.mubr.f32.mxu0 %v3156_v1  ;;  %1333 = vmatprep.mubr.f32.mxu1 %v3156_v1 }
 0x14b   : > { %3045 = vmatmul.mubr.msk.f32.vlgmr.msra.gmra.mxu1 %vm258_vm8, %v3042_v63  ;;  %3033 = vmatmul.mubr.msk.f32.vlgmr.msra.gmra.mxu0 %vm258_vm8, %v3030_v0  ;;  %v1371_v8 = vsel %vm1369_vm11, %v1366_v4, %v3537_v7  ;;  %v3050_v7 = vld [vmem:[%s3824_s1 + $0x2c] sm:$0xf]  ;;  %v1370_v17 = vsel %vm1369_vm11, %v3563_v34, %v1366_v4  ;;  %v3094_v63 = vld [vmem:[%s3824_s1 + $0x58] sm:$0xf] }
 0x14c   : > { %3052 = vmatpush1.msk.msra.mxu1 %vm262_vm5, %v1480_v5  ;;  %3040 = vmatpush1.msk.msra.mxu0 %vm262_vm5, %v1150_v6 }
 0x14d   : > { %3047 = vmatprep.subr.msk.mxu0 %vm262_vm5, %v1371_v8  ;;  %1223 = vmatprep.mubr.f32.mxu0 %v3156_v1  ;;  %v3098_v8 = vld [vmem:[%s3824_s1 + $0x5c] sm:$0xf] }
 0x14e   : > { %v1999_v14 = vpop.permute.xlu1 %1998  ;;  %v1675_v15 = vpop.permute.xlu0 %1674  ;;  %1553 = vmatprep.mubr.f32.mxu1 %v3156_v1 }
 0x14f   : > { %v1679_v16 = vsel %vm1461_vm9, %v1675_v15, %v3545_v10  ;;  %3041 = vmatmul.mubr.msk.f32.vlgmr.msra.gmra.mxu0 %vm258_vm8, %v3038_v9  ;;  %v1678_v18 = vsel %vm1461_vm9, %v3567_v27, %v1675_v15  ;;  %v3046_v10 = vld [vmem:[%s3824_s1 + $0x28] sm:$0xf]  ;;  %3053 = vmatmul.mubr.msk.f32.vlgmr.msra.gmra.mxu1 %vm258_vm8, %v3050_v7  ;;  %v2003_v31 = vsel %vm3835_vm1, %v1999_v14, %v3551_v13  ;;  %v3074_v13 = vld [vmem:[%s3824_s1 + $0x44] sm:$0xf] }
 0x150   : > { %3059 = vmatprep.subr.msk.mxu1 %vm262_vm5, %v1679_v16  ;;  %3048 = vmatpush1.msk.msra.mxu0 %vm262_vm5, %v1370_v17  ;;  %v2002_v23 = vsel %vm3836_vm2, %v3565_v26, %v1999_v14  ;;  %v3182_v17 = vmov 839922192  }
 0x151   : > { %1443 = vmatprep.mubr.f32.mxu0 %v3156_v1  ;;  %3055 = vmatprep.subr.msk.mxu0 %vm262_vm5, %v3482_v24  ;;  %v1787_v24 = vsel %vm1351_vm10, %v1783_v3, %v3547_v11  ;;  %v1786_v11 = vsel %vm1351_vm10, %v3561_v30, %v1783_v3  ;;  %vm3841_vm10 = vcmask 801792  }
 0x152   : > { %v2101_v19 = vpop.permute.xlu1 %2100  ;;  %v1891_v20 = vpop.permute.xlu0 %1890  ;;  %3060 = vmatpush1.msk.msra.mxu1 %vm262_vm5, %v1678_v18  ;;  %1751 = vmatprep.mubr.f32.mxu1 %v3156_v1  ;;  %vm3842_vm11 = vmmov %vm3841_vm10  ;;  %v208_v18 = vunpack.c.l.s4 %v3182_v17 }
 0x153   : > { %v1895_v25 = vsel %vm1241_vm6, %v1891_v20, %v3549_v12  ;;  %3049 = vmatmul.mubr.msk.f32.vlgmr.msra.gmra.mxu0 %vm258_vm8, %v3046_v10  ;;  %v1894_v34 = vsel %vm1241_vm6, %v3569_v38, %v1891_v20  ;;  %v3054_v12 = vld [vmem:[%s3824_s1 + $0x30] sm:$0xf]  ;;  %3061 = vmatmul.mubr.msk.f32.vlgmr.msra.gmra.mxu1 %vm258_vm8, %v3058_v28  ;;  %vm3839_vm6 = vcmask 900096  }
 0x154   : > { %3067 = vmatprep.subr.msk.mxu1 %vm262_vm5, %v1895_v25  ;;  %3056 = vmatpush1.msk.msra.mxu0 %vm262_vm5, %v3252_v21  ;;  %v3066_v21 = vld [vmem:[%s3824_s1 + $0x3c] sm:$0xf]  ;;  %vm3840_vm9 = vmmov %vm3839_vm6  ;;  %v209_v10 = vunpack.c.0.s8 %v208_v18 }
 0x155   : > { %1643 = vmatprep.mubr.f32.mxu0 %v3156_v1  ;;  %3063 = vmatprep.subr.msk.mxu0 %vm262_vm5, %v1787_v24 }
 0x156   : > { %v2208_v27 = vpop.permute.xlu1 %2207  ;;  %v2099_v29 = vpop.permute.xlu0 %2098  ;;  %3068 = vmatpush1.msk.msra.mxu1 %vm262_vm5, %v1894_v34  ;;  %1967 = vmatprep.mubr.f32.mxu1 %v3156_v1  ;;  %v212_v20 = vsub.s32 %v209_v10, %v3220_v2 }
 0x157   : > { %v2104_v38 = vsel %vm2102_vm0, %v2099_v29, %v2101_v19  ;;  %3057 = vmatmul.mubr.msk.f32.vlgmr.msra.gmra.mxu0 %vm258_vm8, %v3054_v12  ;;  %3069 = vmatmul.mubr.msk.f32.vlgmr.msra.gmra.mxu1 %vm258_vm8, %v3066_v21 }
 0x158   : > { %3075 = vmatprep.subr.msk.mxu1 %vm262_vm5, %v2104_v38  ;;  %3064 = vmatpush1.msk.msra.mxu0 %vm262_vm5, %v1786_v11 }
 0x159   : > { %1859 = vmatprep.mubr.f32.mxu0 %v3156_v1  ;;  %3071 = vmatprep.subr.msk.mxu0 %vm262_vm5, %v2003_v31 }
 0x15a   : > { %v2206_v32 = vpop.permute.xlu1 %2205  ;;  %v2097_v39 = vpop.permute.xlu0 %2096  ;;  %2176 = vmatprep.mubr.f32.mxu1 %v3156_v1 }
 0x15b   : > { %v2103_v30 = vsel %vm2102_vm0, %v2097_v39, %v2099_v29  ;;  %3065 = vmatmul.mubr.msk.f32.vlgmr.msra.gmra.mxu0 %vm258_vm8, %v3062_v35  ;;  %v2211_v26 = vsel %vm3838_vm4, %v2206_v32, %v2208_v27  ;;  %vm3847_vm0 = vcmask 769024  }
 0x15c   : > { %3076 = vmatpush1.msk.msra.mxu1 %vm262_vm5, %v2103_v30  ;;  %3072 = vmatpush1.msk.msra.mxu0 %vm262_vm5, %v2002_v23  ;;  %vm3848_vm1 = vmmov %vm3847_vm0 }
 0x15d   : > { %2075 = vmatprep.mubr.f32.mxu0 %v3156_v1  ;;  %3077 = vmatmul.mubr.msk.f32.vlgmr.msra.gmra.mxu1 %vm258_vm8, %v3074_v13 }
 0x15e   : > { %v2318_v42 = vpop.permute.xlu1 %2317  ;;  %v2210_v45 = vpop.permute.xlu0 %2209  ;;  %2392 = vmatprep.mubr.f32.mxu1 %v3156_v1 }
 0x15f   : > { %v2212_v40 = vsel %vm3837_vm3, %v2208_v27, %v2210_v45  ;;  %3073 = vmatmul.mubr.msk.f32.vlgmr.msra.gmra.mxu0 %vm258_vm8, %v3070_v41 }
 0x160   : > { %3079 = vmatprep.subr.msk.mxu0 %vm262_vm5, %v2212_v40  ;;  %2284 = vmatprep.mubr.f32.mxu0 %v3156_v1 }
 0x161   : > { %3080 = vmatpush1.msk.msra.mxu0 %vm262_vm5, %v2211_v26 }
 0x162   : > { %v2424_v47 = vpop.permute.xlu1 %2423  ;;  %v2316_v50 = vpop.permute.xlu0 %2315 }
 0x163   : > { %v2320_v49 = vsel %vm3839_vm6, %v2316_v50, %v2318_v42  ;;  %3081 = vmatmul.mubr.msk.f32.vlgmr.msra.gmra.mxu0 %vm258_vm8, %v3078_v44 }
 0x164   : > { %3083 = vmatprep.subr.msk.mxu1 %vm262_vm5, %v2320_v49  ;;  %2500 = vmatprep.mubr.f32.mxu0 %v3156_v1 }
 0x166   : > { %v2422_v33 = vpop.permute.xlu1 %2421  ;;  %v2314_v51 = vpop.permute.xlu0 %2313 }
 0x167   : > { %v2319_v54 = vsel %vm3840_vm9, %v2314_v51, %v2316_v50  ;;  %v2427_v58 = vsel %vm3842_vm11, %v2422_v33, %v2424_v47 }
 0x168   : > { %3084 = vmatpush1.msk.msra.mxu1 %vm262_vm5, %v2319_v54 }
 0x169   : > { %3085 = vmatmul.mubr.msk.f32.vlgmr.msra.gmra.mxu1 %vm258_vm8, %v3082_v52 }
 0x16a   : > { %v2534_v43 = vpop.permute.xlu1 %2533  ;;  %v2426_v56 = vpop.permute.xlu0 %2425  ;;  %2608 = vmatprep.mubr.f32.mxu1 %v3156_v1 }
 0x16b   : > { %v2428_v48 = vsel %vm3841_vm10, %v2424_v47, %v2426_v56 }
 0x16c   : > { %3087 = vmatprep.subr.msk.mxu0 %vm262_vm5, %v2428_v48 }
 0x16d   : > { %3088 = vmatpush1.msk.msra.mxu0 %vm262_vm5, %v2427_v58 }
 0x16e   : > { %v2632_v59 = vpop.permute.xlu1 %2631  ;;  %v2532_v60 = vpop.permute.xlu0 %2531  ;;  %3089 = vmatmul.mubr.msk.f32.vlgmr.msra.gmra.mxu0 %vm258_vm8, %v3086_v57 }
 0x16f   : > { %v2536_v53 = vsel %vm3843_vm12, %v2532_v60, %v2534_v43  ;;  %2709 = vmatprep.mubr.f32.mxu0 %v3156_v1 }
 0x170   : > { %3091 = vmatprep.subr.msk.mxu1 %vm262_vm5, %v2536_v53 }
 0x172   : > { %v2630_v55 = vpop.permute.xlu1 %2629  ;;  %v2530_v46 = vpop.permute.xlu0 %2529 }
 0x173   : > { %v2535_v36 = vsel %vm3844_vm13, %v2530_v46, %v2532_v60  ;;  %v2636_v0 = vsel %vm2635_vm14, %v2630_v55, %v2632_v59 }
 0x174   : > { %3092 = vmatpush1.msk.msra.mxu1 %vm262_vm5, %v2535_v36 }
 0x175   : > { %3093 = vmatmul.mubr.msk.f32.vlgmr.msra.gmra.mxu1 %vm258_vm8, %v3090_v22 }
 0x176   : > { %v2743_v61 = vpop.permute.xlu1 %2742  ;;  %v2634_v37 = vpop.permute.xlu0 %2633  ;;  %2817 = vmatprep.mubr.f32.mxu1 %v3156_v1 }
 0x177   : > { %v2637_v62 = vsel %vm2635_vm14, %v2632_v59, %v2634_v37 }
 0x178   : > { %3095 = vmatprep.subr.msk.mxu0 %vm262_vm5, %v2637_v62 }
 0x179   : > { %3096 = vmatpush1.msk.msra.mxu0 %vm262_vm5, %v2636_v0 }
 0x17a   : > { %v2741_v3 = vpop.permute.xlu0 %2740  ;;  %3097 = vmatmul.mubr.msk.f32.vlgmr.msra.gmra.mxu0 %vm258_vm8, %v3094_v63  ;;  %v2849_v4 = vpop.permute.xlu1 %2848 }
 0x17b   : > { %v2745_v5 = vsel %vm3845_vm15, %v2741_v3, %v2743_v61  ;;  %2925 = vmatprep.mubr.f32.mxu0 %v3156_v1  ;;  %v3102_v1 = vld [vmem:[%s3824_s1 + $0x60] sm:$0xf] }
 0x17c   : > { %3099 = vmatprep.subr.msk.mxu1 %vm262_vm5, %v2745_v5 }
 0x17e   : > { %v2739_v6 = vpop.permute.xlu0 %2738  ;;  %v2847_v14 = vpop.permute.xlu1 %2846 }
 0x17f   : > { %v2744_v9 = vsel %vm3846_vm7, %v2739_v6, %v2741_v3  ;;  %v2852_v7 = vsel %vm3848_vm1, %v2847_v14, %v2849_v4 }
 0x180   : > { %3100 = vmatpush1.msk.msra.mxu1 %vm262_vm5, %v2744_v9 }
 0x181   : > { %3101 = vmatmul.mubr.msk.f32.vlgmr.msra.gmra.mxu1 %vm258_vm8, %v3098_v8 }
 0x182   : > { %v2851_v15 = vpop.permute.xlu0 %2850 }
 0x183   : > { %v2853_v16 = vsel %vm3847_vm0, %v2849_v4, %v2851_v15 }
 0x184   : > { %3103 = vmatprep.subr.msk.mxu0 %vm262_vm5, %v2853_v16 }
 0x185   : > { %3104 = vmatpush1.msk.msra.mxu0 %vm262_vm5, %v2852_v7 }
 0x186   : > { %3105 = vmatmul.mubr.msk.f32.vlgmr.msra.gmra.mxu0 %vm258_vm8, %v3102_v1 }
 0x18f   : > { %v206_v25 = vpop.permute.xlu0 %205 }
 0x190   : > { %v213_v12 = vrot.slane %v206_v25, %v212_v20 }
 0x1fa   : > { %v453_v19 = vpop.f32.mrf.mxu1 }
 0x1fc   : > { %v455_v28 = vpop.f32.mrf.mxu1 }
 0x1fd   : > { %v460_v21 = vcombine.low %v453_v19, %v455_v28 }
 0x1fe   : > { %v333_v34 = vpop.f32.mrf.mxu0  ;;  %v674_v24 = vpop.f32.mrf.mxu1 }
 0x200   : > { %v335_v27 = vpop.f32.mrf.mxu0  ;;  %v676_v29 = vpop.f32.mrf.mxu1 }
 0x201   : > { %v340_v38 = vcombine.low %v333_v34, %v335_v27  ;;  %v681_v23 = vcombine.low %v674_v24, %v676_v29 }
 0x203   : > { %v342_v11 = vadd.f32 %v340_v38, %v213_v12  ;;  %v904_v31 = vpop.f32.mrf.mxu1  ;;  %v554_v35 = vpop.f32.mrf.mxu0 }
 0x205   : > { %v462_v32 = vadd.f32 %v460_v21, %v342_v11  ;;  %v906_v39 = vpop.f32.mrf.mxu1  ;;  %v556_v30 = vpop.f32.mrf.mxu0 }
 0x206   : > { %v561_v13 = vcombine.low %v554_v35, %v556_v30  ;;  %v911_v47 = vcombine.low %v904_v31, %v906_v39 }
 0x207   : > { %v794_v41 = vpop.f32.mrf.mxu0  ;;  %v1115_v42 = vpop.f32.mrf.mxu1 }
 0x208   : > { %v563_v2 = vadd.f32 %v561_v13, %v462_v32 }
 0x209   : > { %v796_v45 = vpop.f32.mrf.mxu0  ;;  %v1117_v40 = vpop.f32.mrf.mxu1 }
 0x20a   : > { %v683_v26 = vadd.f32 %v681_v23, %v563_v2  ;;  %v801_v44 = vcombine.low %v794_v41, %v796_v45  ;;  %v1122_v56 = vcombine.low %v1115_v42, %v1117_v40 }
 0x20b   : > { %v1014_v50 = vpop.f32.mrf.mxu0  ;;  %v1335_v49 = vpop.f32.mrf.mxu1 }
 0x20c   : > { %v803_v33 = vadd.f32 %v801_v44, %v683_v26 }
 0x20d   : > { %v1016_v51 = vpop.f32.mrf.mxu0  ;;  %v1337_v52 = vpop.f32.mrf.mxu1 }
 0x20e   : > { %v913_v54 = vadd.f32 %v911_v47, %v803_v33  ;;  %v1021_v43 = vcombine.low %v1014_v50, %v1016_v51  ;;  %v1342_v55 = vcombine.low %v1335_v49, %v1337_v52 }
 0x20f   : > { %v1225_v48 = vpop.f32.mrf.mxu0  ;;  %v1555_v59 = vpop.f32.mrf.mxu1 }
 0x210   : > { %v1023_v57 = vadd.f32 %v1021_v43, %v913_v54 }
 0x211   : > { %v1227_v58 = vpop.f32.mrf.mxu0  ;;  %v1557_v22 = vpop.f32.mrf.mxu1 }
 0x212   : > { %v1124_v60 = vadd.f32 %v1122_v56, %v1023_v57  ;;  %v1232_v53 = vcombine.low %v1225_v48, %v1227_v58  ;;  %v1562_v0 = vcombine.low %v1555_v59, %v1557_v22 }
 0x213   : > { %v1445_v46 = vpop.f32.mrf.mxu0  ;;  %v1753_v37 = vpop.f32.mrf.mxu1 }
 0x214   : > { %v1234_v36 = vadd.f32 %v1232_v53, %v1124_v60 }
 0x215   : > { %v1447_v61 = vpop.f32.mrf.mxu0  ;;  %v1755_v6 = vpop.f32.mrf.mxu1 }
 0x216   : > { %v1344_v62 = vadd.f32 %v1342_v55, %v1234_v36  ;;  %v1452_v63 = vcombine.low %v1445_v46, %v1447_v61  ;;  %v1760_v16 = vcombine.low %v1753_v37, %v1755_v6 }
 0x217   : > { %v1645_v3 = vpop.f32.mrf.mxu0  ;;  %v1969_v7 = vpop.f32.mrf.mxu1 }
 0x218   : > { %v1454_v4 = vadd.f32 %v1452_v63, %v1344_v62 }
 0x219   : > { %v1647_v5 = vpop.f32.mrf.mxu0  ;;  %v1971_v10 = vpop.f32.mrf.mxu1 }
 0x21a   : > { %v1564_v8 = vadd.f32 %v1562_v0, %v1454_v4  ;;  %v1652_v9 = vcombine.low %v1645_v3, %v1647_v5  ;;  %v1976_v25 = vcombine.low %v1969_v7, %v1971_v10 }
 0x21b   : > { %v1861_v14 = vpop.f32.mrf.mxu0 }
 0x21c   : > { %v1654_v15 = vadd.f32 %v1652_v9, %v1564_v8 }
 0x21d   : > { %v1863_v1 = vpop.f32.mrf.mxu0  ;;  %v2178_v34 = vpop.f32.mrf.mxu1 }
 0x21e   : > { %v1762_v17 = vadd.f32 %v1760_v16, %v1654_v15  ;;  %v1868_v18 = vcombine.low %v1861_v14, %v1863_v1 }
 0x21f   : > { %v2077_v19 = vpop.f32.mrf.mxu0  ;;  %v2180_v27 = vpop.f32.mrf.mxu1 }
 0x220   : > { %v1870_v20 = vadd.f32 %v1868_v18, %v1762_v17  ;;  %v2185_v21 = vcombine.low %v2178_v34, %v2180_v27 }
 0x221   : > { %v2079_v28 = vpop.f32.mrf.mxu0 }
 0x222   : > { %v1978_v24 = vadd.f32 %v1976_v25, %v1870_v20  ;;  %v2084_v12 = vcombine.low %v2077_v19, %v2079_v28 }
 0x223   : > { %v2286_v29 = vpop.f32.mrf.mxu0 }
 0x224   : > { %v2086_v38 = vadd.f32 %v2084_v12, %v1978_v24 }
 0x225   : > { %v2288_v11 = vpop.f32.mrf.mxu0 }
 0x226   : > { %v2187_v35 = vadd.f32 %v2185_v21, %v2086_v38  ;;  %v2293_v32 = vcombine.low %v2286_v29, %v2288_v11 }
 0x228   : > { %v2295_v13 = vadd.f32 %v2293_v32, %v2187_v35 }
 0x229   : > { %v2394_v31 = vpop.f32.mrf.mxu1 }
 0x22b   : > { %v2396_v39 = vpop.f32.mrf.mxu1 }
 0x22c   : > { %v2401_v23 = vcombine.low %v2394_v31, %v2396_v39 }
 0x22e   : > { %v2502_v30 = vpop.f32.mrf.mxu0  ;;  %v2403_v2 = vadd.f32 %v2401_v23, %v2295_v13 }
 0x230   : > { %v2504_v41 = vpop.f32.mrf.mxu0 }
 0x231   : > { %v2509_v45 = vcombine.low %v2502_v30, %v2504_v41 }
 0x233   : > { %v2511_v44 = vadd.f32 %v2509_v45, %v2403_v2 }
 0x235   : > { %v2610_v42 = vpop.f32.mrf.mxu1 }
 0x237   : > { %v2612_v40 = vpop.f32.mrf.mxu1 }
 0x238   : > { %v2617_v47 = vcombine.low %v2610_v42, %v2612_v40 }
 0x23a   : > { %v2711_v26 = vpop.f32.mrf.mxu0  ;;  %v2619_v49 = vadd.f32 %v2617_v47, %v2511_v44 }
 0x23c   : > { %v2713_v50 = vpop.f32.mrf.mxu0 }
 0x23d   : > { %v2718_v33 = vcombine.low %v2711_v26, %v2713_v50 }
 0x23f   : > { %v2720_v54 = vadd.f32 %v2718_v33, %v2619_v49 }
 0x241   : > { %v2819_v51 = vpop.f32.mrf.mxu1 }
 0x243   : > { %v2821_v52 = vpop.f32.mrf.mxu1 }
 0x244   : > { %v2826_v43 = vcombine.low %v2819_v51, %v2821_v52 }
 0x246   : > { %v2927_v56 = vpop.f32.mrf.mxu0  ;;  %v2828_v57 = vadd.f32 %v2826_v43, %v2720_v54 }
 0x248   : > { %v2929_v48 = vpop.f32.mrf.mxu0 }
 0x249   : > { %v2934_v58 = vcombine.low %v2927_v56, %v2929_v48 }
 0x24b   : > { %v2936_v59 = vadd.f32 %v2934_v58, %v2828_v57 }
 0x24d   : > { %2939 = vst [vmem:[%s197_s12] sm:$0xff] %v2936_v59 }
 0x24e PF: > { %s14_s15 = sadd.s32 1, %s3154_s15  }
 0x24f   : > { %p11_p4 = scmp.ge.s32.totalorder %s14_s15, 4  }
 0x251   :  { %13 = sbr.rel (!%p11_p4) target bundleno = 1 (0x1), region = 93 }

</bundles_post_ra>
